<compile_context>
chip_gen: v7x
topology: tpu7x:2x2x1
jax: 0.10.0
libtpu: 0.0.40
codegen_flags: <defaults>
</compile_context>

<pallas_src>
import functools

import jax
import jax.numpy as jnp
from jax import lax
from jax.experimental import pallas as pl
from jax.experimental.pallas import tpu as pltpu

BN_EPS = 1e-5


def _round_up(x, m):
    return (x + m - 1) // m * m


def channel_shuffle_jax(x, groups):
    """JAX port of the PyTorch channel_shuffle helper (NCHW)."""
    n, c, h, w = x.shape
    assert c % groups == 0
    cpg = c // groups
    x = x.reshape(n, groups, cpg, h, w)
    x = x.transpose(0, 2, 1, 3, 4)
    return x.reshape(n, c, h, w)


# ------------------------- VMEM planning (per-chip) ------------------------ #
def _vmem_capacity_bytes():
    cap = None
    try:
        info = pltpu.get_tpu_info()
        for name in ("vmem_capacity_bytes", "vmem_bytes", "vmem_size_bytes"):
            v = getattr(info, name, None)
            if v:
                cap = int(v)
                break
    except Exception:
        cap = None
    return cap if cap else (64 << 20)        # conservative default (v7x per-core VMEM)


def _vmem_plan():
    cap = _vmem_capacity_bytes()
    # v5e/v6e (128 MiB) -> limit 112 MiB, budget 56 MiB; v7x (64 MiB) -> limit 48, budget 24.
    vmem_limit = int(max(32 << 20, min(cap - (16 << 20), 112 << 20)))
    budget = vmem_limit // 2                 # everything below is double-buffer-inclusive
    return budget, vmem_limit


# ------------------------------ Pallas kernels ----------------------------- #
def _conv_bn_shifted_matmul_kernel(x_ref, w_ref, s_ref, o_ref, acc_ref, *,
                                   K, WPc, last_bin):
    """In-kernel im2col: conv = sum over K*K taps of a shifted 2-D matmul.

    x_ref:   (L, C)        bf16 one zero-padded image, spatial rows flattened
                           (L = HP*WPc + K - 1, values in {-1, 0, +1})
    w_ref:   (K*K, C, TNo) bf16 per-tap grouped (block-diagonal) weights, BN scale folded
    s_ref:   (1, TNo)      f32 folded shift = beta + (conv_bias - mean) * scale
    o_ref:   (Mrow, TNo)   Mrow = OH*WPc output rows (WPc-strided; extra cols sliced off outside)
    acc_ref: (Mrow, TNo)   f32 accumulator scratch
    """
    Mrow = acc_ref.shape[0]
    acc_ref[...] = jnp.zeros_like(acc_ref)
    for ki in range(K):
        for kj in range(K):
            off = ki * WPc + kj                                   # static tap offset
            xs = x_ref[off:off + Mrow, :]                         # (Mrow, C) shifted view
            acc_ref[...] += jnp.dot(xs, w_ref[ki * K + kj],
                                    preferred_element_type=jnp.float32)   # MXU
    y = acc_ref[...] + s_ref[...]
    if last_bin:
        y = jnp.sign(y)
    o_ref[...] = y.astype(o_ref.dtype)


def _bin_matmul_bn_kernel(p_ref, w_ref, shift_ref, o_ref, *, last_bin):
    """Fallback (stride != 1 / image too large): matmul on pre-built im2col patches."""
    acc = jnp.dot(p_ref[...], w_ref[...], preferred_element_type=jnp.float32)
    y = acc + shift_ref[...]
    if last_bin:
        y = jnp.sign(y)
    o_ref[...] = y.astype(o_ref.dtype)


# ------------------------------ tile pickers ------------------------------- #
def _pick_o_tile(O_pad, C, KK, budget):
    cands = ([O_pad] if O_pad <= 512 else []) + \
            [tn for tn in (512, 384, 256, 128) if tn < O_pad and O_pad % tn == 0]
    for tn in cands:
        if 2 * KK * _round_up(C, 16) * tn * 2 <= budget // 3:
            return tn
    return cands[-1]


def _pick_m_tile(M, Kd_pad, O_pad, *, out_itemsize, budget):
    resident = 2 * Kd_pad * O_pad * 2 + 2 * O_pad * 4        # weights (2 bufs) + shift
    avail = max(budget - resident, 1 << 20)
    per_row = 2 * Kd_pad * 2 + 2 * O_pad * out_itemsize + O_pad * 4
    tm = max(8, avail // per_row)
    tm = (tm // 8) * 8                                       # sublane aligned, no 1024 cap
    if M > 8:                                                # keep >= 2 grid steps
        tm = min(tm, _round_up(pl.cdiv(M, 2), 8))
    return int(max(8, min(tm, _round_up(M, 8))))


# ----------------------------- stride==1 path ------------------------------ #
def _conv_fast_path(xb, conv_w, scale, shift, *, K, padding, groups, last_bin,
                    out_dtype, budget, vmem_limit):
    """In-kernel im2col; one image per grid step.  Returns None if it cannot fit VMEM."""
    N, C, H, W = xb.shape
    O = conv_w.shape[0]
    Og, Cg = O // groups, C // groups
    OH = H + 2 * padding - K + 1
    OW = W + 2 * padding - K + 1
    HP = H + 2 * padding
    WPc = W + 2 * padding                      # widen until OH*WPc is sublane (8) aligned
    while (OH * WPc) % 8 != 0:
        WPc += 1
    Mrow = OH * WPc
    L = HP * WPc + K - 1                       # + K-1 zero tail rows (tap over-read)
    KK = K * K
    O_pad = _round_up(O, 128)
    out_itemsize = jnp.dtype(out_dtype).itemsize

    TNo = _pick_o_tile(O_pad, C, KK, budget)
    no = O_pad // TNo
    w_bytes = 2 * KK * _round_up(C, 16) * TNo * 2
    blk_bytes = (2 * _round_up(L, 16) * _round_up(C, 128) * 2      # input (2 bufs, lane-padded)
                 + 2 * _round_up(Mrow, 16) * TNo * out_itemsize    # output (2 bufs)
                 + _round_up(Mrow, 8) * TNo * 4)                   # f32 accumulator scratch
    if w_bytes + blk_bytes > budget:
        return None                            # whole-image block too big -> fallback path

    # activations: NCHW -> NHWC, zero pad (sign(0)==0 so padding commutes), flatten rows.
    x = xb.transpose(0, 2, 3, 1)
    x = jnp.pad(x, ((0, 0), (padding, padding),
                    (padding, WPc - W - padding), (0, 0)))
    x = x.reshape(N, HP * WPc, C)
    x = jnp.pad(x, ((0, 0), (0, K - 1), (0, 0)))                   # (N, L, C)

    # per-tap grouped weights as dense block-diagonal (C, O_pad), BN scale folded in.
    Wk = jnp.zeros((KK, C, O_pad), jnp.float32)
    for g in range(groups):
        blk = conv_w[g * Og:(g + 1) * Og].transpose(2, 3, 1, 0).reshape(KK, Cg, Og)
        Wk = Wk.at[:, g * Cg:(g + 1) * Cg, g * Og:(g + 1) * Og].set(blk)
    scale_pad = jnp.zeros((O_pad,), jnp.float32).at[:O].set(scale)
    Wk = (Wk * scale_pad[None, None, :]).astype(jnp.bfloat16)
    shift_pad = jnp.zeros((1, O_pad), jnp.float32).at[0, :O].set(shift)

    kern = functools.partial(_conv_bn_shifted_matmul_kernel, K=K, WPc=WPc,
                             last_bin=bool(last_bin))
    out = pl.pallas_call(
        kern,
        out_shape=jax.ShapeDtypeStruct((N * Mrow, O_pad), out_dtype),
        grid_spec=pltpu.PrefetchScalarGridSpec(
            num_scalar_prefetch=0,
            grid=(N, no),
            in_specs=[
                pl.BlockSpec((None, L, C), lambda b, j: (b, 0, 0)),   # one image / step
                pl.BlockSpec((KK, C, TNo), lambda b, j: (0, 0, j)),   # per-tap weights
                pl.BlockSpec((1, TNo), lambda b, j: (0, j)),          # folded shift
            ],
            out_specs=pl.BlockSpec((Mrow, TNo), lambda b, j: (b, j)),
            scratch_shapes=[pltpu.VMEM((Mrow, TNo), jnp.float32)],
        ),
        compiler_params=pltpu.CompilerParams(
            dimension_semantics=("parallel", "parallel"),
            vmem_limit_bytes=vmem_limit),
    )(x, Wk, shift_pad)

    out = out.reshape(N, OH, WPc, O_pad)[:, :, :OW, :O]              # drop padded cols/chans
    return out.transpose(0, 3, 1, 2)                                 # NHWC -> NCHW


# ------------------------ fallback (patches) path --------------------------- #
def _conv_patches_path(xb, conv_w, scale, shift, *, K, stride, padding, groups,
                       last_bin, out_dtype, budget, vmem_limit):
    # TODO(synk): extend the in-kernel im2col path to stride > 1 (strided taps / halo DMA).
    N, C, H, W = xb.shape
    O = conv_w.shape[0]
    Og, Cg = O // groups, C // groups
    OH = (H + 2 * padding - K) // stride + 1
    OW = (W + 2 * padding - K) // stride + 1
    xp = jnp.pad(xb, ((0, 0), (0, 0), (padding, padding), (padding, padding)))
    cols = []
    for ki in range(K):
        for kj in range(K):
            cols.append(xp[:, :, ki:ki + stride * OH:stride, kj:kj + stride * OW:stride])
    patches = jnp.stack(cols, axis=-1)                 # (N, C, OH, OW, K*K)
    patches = patches.transpose(0, 2, 3, 1, 4)         # (N, OH, OW, C, K*K)
    M = N * OH * OW
    Kd = C * K * K
    Kd_pad = _round_up(Kd, 128)
    O_pad = _round_up(O, 128)
    patches = patches.reshape(M, Kd)
    if Kd_pad != Kd:
        patches = jnp.pad(patches, ((0, 0), (0, Kd_pad - Kd)))

    w_g = conv_w.reshape(groups, Og, Cg * K * K).transpose(0, 2, 1)        # (G, Cg*K*K, Og)
    w_bd = jax.scipy.linalg.block_diag(*[w_g[g] for g in range(groups)])   # (Kd, O)
    w_bd = w_bd * scale[None, :]
    w_bd = jnp.pad(w_bd, ((0, Kd_pad - Kd), (0, O_pad - O))).astype(jnp.bfloat16)
    shift_pad = jnp.zeros((1, O_pad), jnp.float32).at[0, :O].set(shift)

    out_itemsize = jnp.dtype(out_dtype).itemsize
    TM = _pick_m_tile(M, Kd_pad, O_pad, out_itemsize=out_itemsize, budget=budget)
    num_tiles = pl.cdiv(M, TM)
    M_pad = num_tiles * TM
    if M_pad != M:
        patches = jnp.pad(patches, ((0, M_pad - M), (0, 0)))

    kern = functools.partial(_bin_matmul_bn_kernel, last_bin=bool(last_bin))
    out = pl.pallas_call(
        kern,
        out_shape=jax.ShapeDtypeStruct((M_pad, O_pad), out_dtype),
        grid_spec=pltpu.PrefetchScalarGridSpec(
            num_scalar_prefetch=0,
            grid=(num_tiles,),
            in_specs=[
                pl.BlockSpec((TM, Kd_pad), lambda i: (i, 0)),     # streamed patch tile
                pl.BlockSpec((Kd_pad, O_pad), lambda i: (0, 0)),  # resident weights
                pl.BlockSpec((1, O_pad), lambda i: (0, 0)),       # resident shift
            ],
            out_specs=pl.BlockSpec((TM, O_pad), lambda i: (i, 0)),
        ),
        compiler_params=pltpu.CompilerParams(
            dimension_semantics=("parallel",), vmem_limit_bytes=vmem_limit),
    )(patches, w_bd, shift_pad)

    out = out[:M, :O].reshape(N, OH, OW, O).transpose(0, 3, 1, 2)
    return out


# ---------------------------------- wrapper -------------------------------- #
def tnn_bin_conv2d(x, conv_w, conv_b, bn_gamma, bn_beta, bn_mean, bn_var, *,
                   kernel_size, stride, padding, groups,
                   channel_shuffle_flag=0, shuffle_groups=1, last_bin=0,
                   out_bf16=False):
    N, C, H, W = x.shape
    O = conv_w.shape[0]
    K = kernel_size
    assert conv_w.shape == (O, C // groups, K, K)

    # activation_bin(A=2): sign(x).  Exact in bf16 -> binarize + downcast up front.
    xb = jnp.sign(x).astype(jnp.bfloat16)
    if channel_shuffle_flag:
        xb = channel_shuffle_jax(xb, shuffle_groups)

    # Fold conv bias + inference BatchNorm into per-channel scale/shift; the scale goes
    # into the weight columns (activations are only +-1/0, unscaled).
    scale = (bn_gamma / jnp.sqrt(bn_var + BN_EPS)).astype(jnp.float32)
    shift = (bn_beta + (conv_b - bn_mean) * scale).astype(jnp.float32)

    budget, vmem_limit = _vmem_plan()
    # last_bin output is exactly {-1,0,+1}; out_bf16 lets non-final binarized layers halve writeback.
    out_dtype = jnp.bfloat16 if (last_bin or out_bf16) else jnp.float32

    out = None
    if stride == 1:
        out = _conv_fast_path(xb, conv_w, scale, shift, K=K, padding=padding,
                              groups=groups, last_bin=last_bin, out_dtype=out_dtype,
                              budget=budget, vmem_limit=vmem_limit)
    if out is None:
        out = _conv_patches_path(xb, conv_w, scale, shift, K=K, stride=stride,
                                 padding=padding, groups=groups, last_bin=last_bin,
                                 out_dtype=out_dtype, budget=budget,
                                 vmem_limit=vmem_limit)
    return out


# ----------------------------- pure-JAX reference --------------------------- #
def reference(x, conv_w, conv_b, bn_gamma, bn_beta, bn_mean, bn_var, *,
              kernel_size, stride, padding, groups,
              channel_shuffle_flag=0, shuffle_groups=1, last_bin=0,
              emulate_kernel_quantization=False):
    xa = jnp.sign(x)
    if channel_shuffle_flag:
        xa = channel_shuffle_jax(xa, shuffle_groups)
    scale = bn_gamma / jnp.sqrt(bn_var + BN_EPS)
    shift = bn_beta + (conv_b - bn_mean) * scale
    if emulate_kernel_quantization:
        w = (conv_w * scale[:, None, None, None]).astype(jnp.bfloat16).astype(jnp.float32)
        y = lax.conv_general_dilated(
            xa, w, window_strides=(stride, stride),
            padding=[(padding, padding), (padding, padding)],
            dimension_numbers=("NCHW", "OIHW", "NCHW"),
            feature_group_count=groups, precision=lax.Precision.HIGHEST)
        y = y + shift[None, :, None, None]
    else:
        y = lax.conv_general_dilated(
            xa, conv_w, window_strides=(stride, stride),
            padding=[(padding, padding), (padding, padding)],
            dimension_numbers=("NCHW", "OIHW", "NCHW"),
            feature_group_count=groups, precision=lax.Precision.HIGHEST)
        y = y + conv_b[None, :, None, None]
        y = (y - bn_mean[None, :, None, None]) / jnp.sqrt(bn_var + BN_EPS)[None, :, None, None]
        y = y * bn_gamma[None, :, None, None] + bn_beta[None, :, None, None]
    if last_bin:
        y = jnp.sign(y)
    return y


if __name__ == "__main__":
    # Small shapes consistent with the NIN_GC usage of this block.
    N, C, H, W = 2, 4, 16, 16
    O, K, S, P, G = 8, 3, 1, 1, 2
    SHUF_G = 2

    key = jax.random.PRNGKey(0)
    k1, k2, k3, k4, k5, k6, k7 = jax.random.split(key, 7)
    x = jax.random.normal(k1, (N, C, H, W), jnp.float32)
    conv_w = 0.1 * jax.random.normal(k2, (O, C // G, K, K), jnp.float32)
    conv_b = 0.1 * jax.random.normal(k3, (O,), jnp.float32)
    bn_gamma = 1.0 + 0.1 * jax.random.normal(k4, (O,), jnp.float32)
    bn_beta = 0.1 * jax.random.normal(k5, (O,), jnp.float32)
    bn_mean = 0.1 * jax.random.normal(k6, (O,), jnp.float32)
    bn_var = jnp.abs(jax.random.normal(k7, (O,), jnp.float32)) + 0.5

    cfg = dict(kernel_size=K, stride=S, padding=P, groups=G,
               channel_shuffle_flag=1, shuffle_groups=SHUF_G)

    # --- stride=1, last_bin=0 (in-kernel im2col path) ---
    out = tnn_bin_conv2d(x, conv_w, conv_b, bn_gamma, bn_beta, bn_mean, bn_var,
                         last_bin=0, **cfg)
    out = jax.block_until_ready(out)
    assert out.shape == (N, O, H, W) and out.dtype == jnp.float32

    ref_q = reference(x, conv_w, conv_b, bn_gamma, bn_beta, bn_mean, bn_var,
                      last_bin=0, emulate_kernel_quantization=True, **cfg)
    err_q = float(jnp.max(jnp.abs(out - ref_q)))
    assert err_q < 1e-3, f"kernel vs bf16-weight reference max_err={err_q}"

    ref = reference(x, conv_w, conv_b, bn_gamma, bn_beta, bn_mean, bn_var,
                    last_bin=0, **cfg)
    err = float(jnp.max(jnp.abs(out - ref)))
    assert err < 3e-2, f"kernel vs f32 reference max_err={err}"

    # --- last_bin=1 path: output exactly {-1, 0, +1}, stored as bf16 (lossless) ---
    out2 = tnn_bin_conv2d(x, conv_w, conv_b, bn_gamma, bn_beta, bn_mean, bn_var,
                          last_bin=1, **cfg)
    out2 = jax.block_until_ready(out2)
    assert out2.shape == (N, O, H, W) and out2.dtype == jnp.bfloat16
    out2f = out2.astype(jnp.float32)
    assert bool(jnp.all((out2f == 0.0) | (jnp.abs(out2f) == 1.0)))

    # --- bf16 output for a non-final binarized layer (halved writeback) ---
    out3 = tnn_bin_conv2d(x, conv_w, conv_b, bn_gamma, bn_beta, bn_mean, bn_var,
                          last_bin=0, out_bf16=True, **cfg)
    out3 = jax.block_until_ready(out3)
    assert out3.shape == (N, O, H, W) and out3.dtype == jnp.bfloat16
    err3 = float(jnp.max(jnp.abs(out3.astype(jnp.float32) - ref_q)))
    assert err3 < 8e-2, f"bf16-output kernel max_err={err3}"

    # --- stride=2 exercises the patches fallback path ---
    cfg2 = dict(kernel_size=K, stride=2, padding=P, groups=G,
                channel_shuffle_flag=1, shuffle_groups=SHUF_G)
    out4 = tnn_bin_conv2d(x, conv_w, conv_b, bn_gamma, bn_beta, bn_mean, bn_var,
                          last_bin=0, **cfg2)
    out4 = jax.block_until_ready(out4)
    assert out4.shape == (N, O, 8, 8) and out4.dtype == jnp.float32
    ref4 = reference(x, conv_w, conv_b, bn_gamma, bn_beta, bn_mean, bn_var,
                     last_bin=0, emulate_kernel_quantization=True, **cfg2)
    err4 = float(jnp.max(jnp.abs(out4 - ref4)))
    assert err4 < 1e-3, f"fallback kernel vs bf16-weight reference max_err={err4}"

    print("KERNEL_OK")
</pallas_src>

<mosaic_0001>
module attributes {stable_mosaic.version = 11 : i64} {
  func.func @_conv_bn_shifted_matmul_kernel(%arg0: i32, %arg1: i32, %arg2: memref<1x326x4xbf16, #tpu.memory_space<vmem>>, %arg3: memref<9x4x128xbf16, #tpu.memory_space<vmem>>, %arg4: memref<1x128xf32, #tpu.memory_space<vmem>>, %arg5: memref<288x128xf32, #tpu.memory_space<vmem>>, %arg6: memref<288x128xf32, #tpu.memory_space<vmem>>) attributes {dimension_semantics = [#tpu.dimension_semantics<parallel>, #tpu.dimension_semantics<parallel>], iteration_bounds = array<i64: 2, 1>, scalar_prefetch = 0 : i64, scratch_operands = 1 : i64, tpu.core_type = #tpu.core_type<tc>, window_params = [{transform_indices = @transform_0, window_bounds = array<i64: 1, 326, 4>}, {transform_indices = @transform_1, window_bounds = array<i64: 9, 4, 128>}, {transform_indices = @transform_2, window_bounds = array<i64: 1, 128>}, {transform_indices = @transform_3, window_bounds = array<i64: 288, 128>}]} {
    %cst = arith.constant 0.000000e+00 : f32
    %0 = vector.broadcast %cst : f32 to vector<288x128xf32>
    %c0 = arith.constant 0 : index
    %c0_0 = arith.constant 0 : index
    %1 = vector.load %arg6[%c0, %c0_0] : memref<288x128xf32, #tpu.memory_space<vmem>>, vector<288x128xf32>
    tpu.vector_store %arg6[%c0, %c0_0], %0 {strides = array<i32>} : memref<288x128xf32, #tpu.memory_space<vmem>>, vector<288x128xf32>,
    %c0_1 = arith.constant 0 : index
    %c0_2 = arith.constant 0 : index
    %c0_3 = arith.constant 0 : index
    %2 = vector.load %arg2[%c0_1, %c0_2, %c0_3] : memref<1x326x4xbf16, #tpu.memory_space<vmem>>, vector<1x288x4xbf16>
    %3 = vector.shape_cast %2 : vector<1x288x4xbf16> to vector<288x4xbf16>
    %c0_4 = arith.constant 0 : index
    %c0_5 = arith.constant 0 : index
    %4 = vector.load %arg6[%c0_4, %c0_5] : memref<288x128xf32, #tpu.memory_space<vmem>>, vector<288x128xf32>
    %c0_6 = arith.constant 0 : index
    %c0_7 = arith.constant 0 : index
    %c0_8 = arith.constant 0 : index
    %5 = vector.load %arg3[%c0_6, %c0_7, %c0_8] : memref<9x4x128xbf16, #tpu.memory_space<vmem>>, vector<1x4x128xbf16>
    %6 = vector.shape_cast %5 : vector<1x4x128xbf16> to vector<4x128xbf16>
    %cst_9 = arith.constant dense<0.000000e+00> : vector<288x128xf32>
    %7 = tpu.matmul %3, %6, %cst_9 {dimension_numbers = #tpu.dot_dimension_numbers<[1], [0], [0], [1], [0, 0, 1, 1], [], []>} : vector<288x4xbf16>, vector<4x128xbf16>, vector<288x128xf32> -> vector<288x128xf32>
    %8 = arith.addf %4, %7 : vector<288x128xf32>
    %c0_10 = arith.constant 0 : index
    %c0_11 = arith.constant 0 : index
    %9 = vector.load %arg6[%c0_10, %c0_11] : memref<288x128xf32, #tpu.memory_space<vmem>>, vector<288x128xf32>
    tpu.vector_store %arg6[%c0_10, %c0_11], %8 {strides = array<i32>} : memref<288x128xf32, #tpu.memory_space<vmem>>, vector<288x128xf32>,
    %c0_12 = arith.constant 0 : index
    %c1 = arith.constant 1 : index
    %c0_13 = arith.constant 0 : index
    %10 = vector.load %arg2[%c0_12, %c1, %c0_13] : memref<1x326x4xbf16, #tpu.memory_space<vmem>>, vector<1x288x4xbf16>
    %11 = vector.shape_cast %10 : vector<1x288x4xbf16> to vector<288x4xbf16>
    %c0_14 = arith.constant 0 : index
    %c0_15 = arith.constant 0 : index
    %12 = vector.load %arg6[%c0_14, %c0_15] : memref<288x128xf32, #tpu.memory_space<vmem>>, vector<288x128xf32>
    %c1_16 = arith.constant 1 : index
    %c0_17 = arith.constant 0 : index
    %c0_18 = arith.constant 0 : index
    %13 = vector.load %arg3[%c1_16, %c0_17, %c0_18] : memref<9x4x128xbf16, #tpu.memory_space<vmem>>, vector<1x4x128xbf16>
    %14 = vector.shape_cast %13 : vector<1x4x128xbf16> to vector<4x128xbf16>
    %cst_19 = arith.constant dense<0.000000e+00> : vector<288x128xf32>
    %15 = tpu.matmul %11, %14, %cst_19 {dimension_numbers = #tpu.dot_dimension_numbers<[1], [0], [0], [1], [0, 0, 1, 1], [], []>} : vector<288x4xbf16>, vector<4x128xbf16>, vector<288x128xf32> -> vector<288x128xf32>
    %16 = arith.addf %12, %15 : vector<288x128xf32>
    %c0_20 = arith.constant 0 : index
    %c0_21 = arith.constant 0 : index
    %17 = vector.load %arg6[%c0_20, %c0_21] : memref<288x128xf32, #tpu.memory_space<vmem>>, vector<288x128xf32>
    tpu.vector_store %arg6[%c0_20, %c0_21], %16 {strides = array<i32>} : memref<288x128xf32, #tpu.memory_space<vmem>>, vector<288x128xf32>,
    %c0_22 = arith.constant 0 : index
    %c2 = arith.constant 2 : index
    %c0_23 = arith.constant 0 : index
    %18 = vector.load %arg2[%c0_22, %c2, %c0_23] : memref<1x326x4xbf16, #tpu.memory_space<vmem>>, vector<1x288x4xbf16>
    %19 = vector.shape_cast %18 : vector<1x288x4xbf16> to vector<288x4xbf16>
    %c0_24 = arith.constant 0 : index
    %c0_25 = arith.constant 0 : index
    %20 = vector.load %arg6[%c0_24, %c0_25] : memref<288x128xf32, #tpu.memory_space<vmem>>, vector<288x128xf32>
    %c2_26 = arith.constant 2 : index
    %c0_27 = arith.constant 0 : index
    %c0_28 = arith.constant 0 : index
    %21 = vector.load %arg3[%c2_26, %c0_27, %c0_28] : memref<9x4x128xbf16, #tpu.memory_space<vmem>>, vector<1x4x128xbf16>
    %22 = vector.shape_cast %21 : vector<1x4x128xbf16> to vector<4x128xbf16>
    %cst_29 = arith.constant dense<0.000000e+00> : vector<288x128xf32>
    %23 = tpu.matmul %19, %22, %cst_29 {dimension_numbers = #tpu.dot_dimension_numbers<[1], [0], [0], [1], [0, 0, 1, 1], [], []>} : vector<288x4xbf16>, vector<4x128xbf16>, vector<288x128xf32> -> vector<288x128xf32>
    %24 = arith.addf %20, %23 : vector<288x128xf32>
    %c0_30 = arith.constant 0 : index
    %c0_31 = arith.constant 0 : index
    %25 = vector.load %arg6[%c0_30, %c0_31] : memref<288x128xf32, #tpu.memory_space<vmem>>, vector<288x128xf32>
    tpu.vector_store %arg6[%c0_30, %c0_31], %24 {strides = array<i32>} : memref<288x128xf32, #tpu.memory_space<vmem>>, vector<288x128xf32>,
    %c0_32 = arith.constant 0 : index
    %c18 = arith.constant 18 : index
    %c0_33 = arith.constant 0 : index
    %26 = vector.load %arg2[%c0_32, %c18, %c0_33] : memref<1x326x4xbf16, #tpu.memory_space<vmem>>, vector<1x288x4xbf16>
    %27 = vector.shape_cast %26 : vector<1x288x4xbf16> to vector<288x4xbf16>
    %c0_34 = arith.constant 0 : index
    %c0_35 = arith.constant 0 : index
    %28 = vector.load %arg6[%c0_34, %c0_35] : memref<288x128xf32, #tpu.memory_space<vmem>>, vector<288x128xf32>
    %c3 = arith.constant 3 : index
    %c0_36 = arith.constant 0 : index
    %c0_37 = arith.constant 0 : index
    %29 = vector.load %arg3[%c3, %c0_36, %c0_37] : memref<9x4x128xbf16, #tpu.memory_space<vmem>>, vector<1x4x128xbf16>
    %30 = vector.shape_cast %29 : vector<1x4x128xbf16> to vector<4x128xbf16>
    %cst_38 = arith.constant dense<0.000000e+00> : vector<288x128xf32>
    %31 = tpu.matmul %27, %30, %cst_38 {dimension_numbers = #tpu.dot_dimension_numbers<[1], [0], [0], [1], [0, 0, 1, 1], [], []>} : vector<288x4xbf16>, vector<4x128xbf16>, vector<288x128xf32> -> vector<288x128xf32>
    %32 = arith.addf %28, %31 : vector<288x128xf32>
    %c0_39 = arith.constant 0 : index
    %c0_40 = arith.constant 0 : index
    %33 = vector.load %arg6[%c0_39, %c0_40] : memref<288x128xf32, #tpu.memory_space<vmem>>, vector<288x128xf32>
    tpu.vector_store %arg6[%c0_39, %c0_40], %32 {strides = array<i32>} : memref<288x128xf32, #tpu.memory_space<vmem>>, vector<288x128xf32>,
    %c0_41 = arith.constant 0 : index
    %c19 = arith.constant 19 : index
    %c0_42 = arith.constant 0 : index
    %34 = vector.load %arg2[%c0_41, %c19, %c0_42] : memref<1x326x4xbf16, #tpu.memory_space<vmem>>, vector<1x288x4xbf16>
    %35 = vector.shape_cast %34 : vector<1x288x4xbf16> to vector<288x4xbf16>
    %c0_43 = arith.constant 0 : index
    %c0_44 = arith.constant 0 : index
    %36 = vector.load %arg6[%c0_43, %c0_44] : memref<288x128xf32, #tpu.memory_space<vmem>>, vector<288x128xf32>
    %c4 = arith.constant 4 : index
    %c0_45 = arith.constant 0 : index
    %c0_46 = arith.constant 0 : index
    %37 = vector.load %arg3[%c4, %c0_45, %c0_46] : memref<9x4x128xbf16, #tpu.memory_space<vmem>>, vector<1x4x128xbf16>
    %38 = vector.shape_cast %37 : vector<1x4x128xbf16> to vector<4x128xbf16>
    %cst_47 = arith.constant dense<0.000000e+00> : vector<288x128xf32>
    %39 = tpu.matmul %35, %38, %cst_47 {dimension_numbers = #tpu.dot_dimension_numbers<[1], [0], [0], [1], [0, 0, 1, 1], [], []>} : vector<288x4xbf16>, vector<4x128xbf16>, vector<288x128xf32> -> vector<288x128xf32>
    %40 = arith.addf %36, %39 : vector<288x128xf32>
    %c0_48 = arith.constant 0 : index
    %c0_49 = arith.constant 0 : index
    %41 = vector.load %arg6[%c0_48, %c0_49] : memref<288x128xf32, #tpu.memory_space<vmem>>, vector<288x128xf32>
    tpu.vector_store %arg6[%c0_48, %c0_49], %40 {strides = array<i32>} : memref<288x128xf32, #tpu.memory_space<vmem>>, vector<288x128xf32>,
    %c0_50 = arith.constant 0 : index
    %c20 = arith.constant 20 : index
    %c0_51 = arith.constant 0 : index
    %42 = vector.load %arg2[%c0_50, %c20, %c0_51] : memref<1x326x4xbf16, #tpu.memory_space<vmem>>, vector<1x288x4xbf16>
    %43 = vector.shape_cast %42 : vector<1x288x4xbf16> to vector<288x4xbf16>
    %c0_52 = arith.constant 0 : index
    %c0_53 = arith.constant 0 : index
    %44 = vector.load %arg6[%c0_52, %c0_53] : memref<288x128xf32, #tpu.memory_space<vmem>>, vector<288x128xf32>
    %c5 = arith.constant 5 : index
    %c0_54 = arith.constant 0 : index
    %c0_55 = arith.constant 0 : index
    %45 = vector.load %arg3[%c5, %c0_54, %c0_55] : memref<9x4x128xbf16, #tpu.memory_space<vmem>>, vector<1x4x128xbf16>
    %46 = vector.shape_cast %45 : vector<1x4x128xbf16> to vector<4x128xbf16>
    %cst_56 = arith.constant dense<0.000000e+00> : vector<288x128xf32>
    %47 = tpu.matmul %43, %46, %cst_56 {dimension_numbers = #tpu.dot_dimension_numbers<[1], [0], [0], [1], [0, 0, 1, 1], [], []>} : vector<288x4xbf16>, vector<4x128xbf16>, vector<288x128xf32> -> vector<288x128xf32>
    %48 = arith.addf %44, %47 : vector<288x128xf32>
    %c0_57 = arith.constant 0 : index
    %c0_58 = arith.constant 0 : index
    %49 = vector.load %arg6[%c0_57, %c0_58] : memref<288x128xf32, #tpu.memory_space<vmem>>, vector<288x128xf32>
    tpu.vector_store %arg6[%c0_57, %c0_58], %48 {strides = array<i32>} : memref<288x128xf32, #tpu.memory_space<vmem>>, vector<288x128xf32>,
    %c0_59 = arith.constant 0 : index
    %c36 = arith.constant 36 : index
    %c0_60 = arith.constant 0 : index
    %50 = vector.load %arg2[%c0_59, %c36, %c0_60] : memref<1x326x4xbf16, #tpu.memory_space<vmem>>, vector<1x288x4xbf16>
    %51 = vector.shape_cast %50 : vector<1x288x4xbf16> to vector<288x4xbf16>
    %c0_61 = arith.constant 0 : index
    %c0_62 = arith.constant 0 : index
    %52 = vector.load %arg6[%c0_61, %c0_62] : memref<288x128xf32, #tpu.memory_space<vmem>>, vector<288x128xf32>
    %c6 = arith.constant 6 : index
    %c0_63 = arith.constant 0 : index
    %c0_64 = arith.constant 0 : index
    %53 = vector.load %arg3[%c6, %c0_63, %c0_64] : memref<9x4x128xbf16, #tpu.memory_space<vmem>>, vector<1x4x128xbf16>
    %54 = vector.shape_cast %53 : vector<1x4x128xbf16> to vector<4x128xbf16>
    %cst_65 = arith.constant dense<0.000000e+00> : vector<288x128xf32>
    %55 = tpu.matmul %51, %54, %cst_65 {dimension_numbers = #tpu.dot_dimension_numbers<[1], [0], [0], [1], [0, 0, 1, 1], [], []>} : vector<288x4xbf16>, vector<4x128xbf16>, vector<288x128xf32> -> vector<288x128xf32>
    %56 = arith.addf %52, %55 : vector<288x128xf32>
    %c0_66 = arith.constant 0 : index
    %c0_67 = arith.constant 0 : index
    %57 = vector.load %arg6[%c0_66, %c0_67] : memref<288x128xf32, #tpu.memory_space<vmem>>, vector<288x128xf32>
    tpu.vector_store %arg6[%c0_66, %c0_67], %56 {strides = array<i32>} : memref<288x128xf32, #tpu.memory_space<vmem>>, vector<288x128xf32>,
    %c0_68 = arith.constant 0 : index
    %c37 = arith.constant 37 : index
    %c0_69 = arith.constant 0 : index
    %58 = vector.load %arg2[%c0_68, %c37, %c0_69] : memref<1x326x4xbf16, #tpu.memory_space<vmem>>, vector<1x288x4xbf16>
    %59 = vector.shape_cast %58 : vector<1x288x4xbf16> to vector<288x4xbf16>
    %c0_70 = arith.constant 0 : index
    %c0_71 = arith.constant 0 : index
    %60 = vector.load %arg6[%c0_70, %c0_71] : memref<288x128xf32, #tpu.memory_space<vmem>>, vector<288x128xf32>
    %c7 = arith.constant 7 : index
    %c0_72 = arith.constant 0 : index
    %c0_73 = arith.constant 0 : index
    %61 = vector.load %arg3[%c7, %c0_72, %c0_73] : memref<9x4x128xbf16, #tpu.memory_space<vmem>>, vector<1x4x128xbf16>
    %62 = vector.shape_cast %61 : vector<1x4x128xbf16> to vector<4x128xbf16>
    %cst_74 = arith.constant dense<0.000000e+00> : vector<288x128xf32>
    %63 = tpu.matmul %59, %62, %cst_74 {dimension_numbers = #tpu.dot_dimension_numbers<[1], [0], [0], [1], [0, 0, 1, 1], [], []>} : vector<288x4xbf16>, vector<4x128xbf16>, vector<288x128xf32> -> vector<288x128xf32>
    %64 = arith.addf %60, %63 : vector<288x128xf32>
    %c0_75 = arith.constant 0 : index
    %c0_76 = arith.constant 0 : index
    %65 = vector.load %arg6[%c0_75, %c0_76] : memref<288x128xf32, #tpu.memory_space<vmem>>, vector<288x128xf32>
    tpu.vector_store %arg6[%c0_75, %c0_76], %64 {strides = array<i32>} : memref<288x128xf32, #tpu.memory_space<vmem>>, vector<288x128xf32>,
    %c0_77 = arith.constant 0 : index
    %c38 = arith.constant 38 : index
    %c0_78 = arith.constant 0 : index
    %66 = vector.load %arg2[%c0_77, %c38, %c0_78] : memref<1x326x4xbf16, #tpu.memory_space<vmem>>, vector<1x288x4xbf16>
    %67 = vector.shape_cast %66 : vector<1x288x4xbf16> to vector<288x4xbf16>
    %c0_79 = arith.constant 0 : index
    %c0_80 = arith.constant 0 : index
    %68 = vector.load %arg6[%c0_79, %c0_80] : memref<288x128xf32, #tpu.memory_space<vmem>>, vector<288x128xf32>
    %c8 = arith.constant 8 : index
    %c0_81 = arith.constant 0 : index
    %c0_82 = arith.constant 0 : index
    %69 = vector.load %arg3[%c8, %c0_81, %c0_82] : memref<9x4x128xbf16, #tpu.memory_space<vmem>>, vector<1x4x128xbf16>
    %70 = vector.shape_cast %69 : vector<1x4x128xbf16> to vector<4x128xbf16>
    %cst_83 = arith.constant dense<0.000000e+00> : vector<288x128xf32>
    %71 = tpu.matmul %67, %70, %cst_83 {dimension_numbers = #tpu.dot_dimension_numbers<[1], [0], [0], [1], [0, 0, 1, 1], [], []>} : vector<288x4xbf16>, vector<4x128xbf16>, vector<288x128xf32> -> vector<288x128xf32>
    %72 = arith.addf %68, %71 : vector<288x128xf32>
    %c0_84 = arith.constant 0 : index
    %c0_85 = arith.constant 0 : index
    %73 = vector.load %arg6[%c0_84, %c0_85] : memref<288x128xf32, #tpu.memory_space<vmem>>, vector<288x128xf32>
    tpu.vector_store %arg6[%c0_84, %c0_85], %72 {strides = array<i32>} : memref<288x128xf32, #tpu.memory_space<vmem>>, vector<288x128xf32>,
    %c0_86 = arith.constant 0 : index
    %c0_87 = arith.constant 0 : index
    %74 = vector.load %arg6[%c0_86, %c0_87] : memref<288x128xf32, #tpu.memory_space<vmem>>, vector<288x128xf32>
    %c0_88 = arith.constant 0 : index
    %c0_89 = arith.constant 0 : index
    %75 = vector.load %arg4[%c0_88, %c0_89] : memref<1x128xf32, #tpu.memory_space<vmem>>, vector<1x128xf32>
    %76 = vector.broadcast %75 : vector<1x128xf32> to vector<288x128xf32>
    %77 = arith.addf %74, %76 : vector<288x128xf32>
    %c0_90 = arith.constant 0 : index
    %c0_91 = arith.constant 0 : index
    %78 = vector.load %arg5[%c0_90, %c0_91] : memref<288x128xf32, #tpu.memory_space<vmem>>, vector<288x128xf32>
    tpu.vector_store %arg5[%c0_90, %c0_91], %77 {strides = array<i32>} : memref<288x128xf32, #tpu.memory_space<vmem>>, vector<288x128xf32>,
    return
  }
  func.func @transform_0(%arg0: i32, %arg1: i32) -> (i32, i32, i32) {
    %c0_i32 = arith.constant 0 : i32
    %c0_i32_0 = arith.constant 0 : i32
    %c0_i32_1 = arith.constant 0 : i32
    return %arg0, %c0_i32, %c0_i32_0 : i32, i32, i32
  }
  func.func @transform_1(%arg0: i32, %arg1: i32) -> (i32, i32, i32) {
    %c0_i32 = arith.constant 0 : i32
    %c0_i32_0 = arith.constant 0 : i32
    %c0_i32_1 = arith.constant 0 : i32
    return %c0_i32, %c0_i32_0, %arg1 : i32, i32, i32
  }
  func.func @transform_2(%arg0: i32, %arg1: i32) -> (i32, i32) {
    %c0_i32 = arith.constant 0 : i32
    %c0_i32_0 = arith.constant 0 : i32
    return %c0_i32, %arg1 : i32, i32
  }
  func.func @transform_3(%arg0: i32, %arg1: i32) -> (i32, i32) {
    %c0_i32 = arith.constant 0 : i32
    return %arg0, %arg1 : i32, i32
  }
}

</mosaic_0001>

<bundles_post_ra>
// kernel: tpu_custom_call.1
= control target key start
LH: loop header
LB: loop body
LE: loop exit
PB: predicated region body
PF: predicated region fallthrough
CT: control target
= control target key end

     0   :  { %8 = vsyncpa [#allocation4], 0  ;;  %s7700_s0 = inlined_call_operand.vmem [shape: bf16[2,326,4], index: 0, kind: input, shape index: {}]   ;;  %s7701_s1 = inlined_call_operand.vmem [shape: bf16[9,4,128], index: 1, kind: input, shape index: {}]   ;;  %s7702_s2 = inlined_call_operand.vmem [shape: f32[1,128], index: 2, kind: input, shape index: {}]   ;;  %s7703_s3 = inlined_call_operand.hbm [shape: f32[576,128], index: 3, kind: output, shape index: {}]  }
   0x1   :  { %10 = vsyncpa [#allocation4 + $0x1], 0  ;;  %s6922_s12 = smov 0   ;;  %s6924_s13 = smov 0  }
   0x2   :  { %s6926_s14 = smov 0   ;;  %s6928_s15 = smov 0  }
   0x3   :  { %s6930_s16 = smov 0   ;;  %s6932_s17 = smov 0  }
   0x4 LB: > { %s5423_s18 = sadd.s32 4294967295, %s6897_s17   ;;  %s5424_s19 = sadd.s32 4294967294, %s6897_s17   ;;  %s6897_s17 = sphi %s6932_s17, %s16_s17   ;;  %s6893_s16 = sphi %s6930_s16, %s7710_s16   ;;  %s6889_s15 = sphi %s6928_s15, %s7709_s15   ;;  %s6885_s14 = sphi %s6926_s14, %s7708_s14   ;;  %s6881_s13 = sphi %s6924_s13, %s7707_s13   ;;  %s6877_s12 = sphi %s6922_s12, %s7706_s12  }
   0x5   : > { %s28_s20 = sadd.s32 1, %s6893_s16  ;;  %s115_s21 = sadd.s32 1, %s6885_s14 }
   0x6   : > { %p30_p0 = scmp.ge.s32.totalorder %s28_s20, 2  ;;  %p125_p1 = scmp.ne.s32.totalorder %s6885_s14, %s6881_s13 }
   0x7   : > { %p126_p2 = scmp.eq.s32.totalorder %s5423_s18, 1  ;;  %p131_p3 = scmp.ne.s32.totalorder %s6881_s13, %s6877_s12 }
   0x8   : > { %s7712_s20 = smov (%p30_p0, %s28_s20), 0  ;;  %p132_p5 = scmp.eq.s32.totalorder %s5424_s19, 1 }
   0x9   : > { %p6962_p4 = por %p126_p2, %p125_p1  ;;  %s110_s23 = ssub.s32 %s6893_s16, %s7712_s20 }
   0xa   : > { %p5429_p6 = scmp.ge.s32.totalorder %s6897_s17, 1  ;;  %p113_p7 = scmp.eq.s32.totalorder %s110_s23, 0 }
   0xb   : > { %p6969_p8 = por %p132_p5, %p131_p3  ;;  %p171_p9 = scmp.lt.s32.totalorder %s6897_s17, 3 }
   0xc   : > { %s6975_s25 = scalar_select %p113_p7, %s6885_s14, %s115_s21  }
   0xd   : > { %p172_p10 = pnand %p5429_p6, %p171_p9 }
   0xe   : > { %v324_v0 = vld [vmem:[%s7701_s1] sm:$0x3] (!%p172_p10)  ;;  %vm470_vm0 = vcmask (!%p172_p10), 1041408   ;;  %p202_p11 = scmp.lt.s32.totalorder (!%p172_p10), %s6889_s15, 1  ;;  %v5581_v2 = vld [vmem:[%s7701_s1 + $0x8] sm:$0x3] (!%p172_p10) }
   0xf   : > { %175 = sbr.rel (%p172_p10) target bundleno = 591 (0x24f), region = 32  ;;  %6579 = vmatprep.subr.msk.bf16.mxu1 (!%p172_p10), %vm470_vm0, %v324_v0  ;;  %v472_v1 = vsel (!%p172_p10), %vm470_vm0, %v324_v0, 0  ;;  %6583 = vmatprep.subr.msk.bf16.mxu0 (!%p172_p10), %vm470_vm0, %v5581_v2  ;;  %v6989_v3 = vsel (!%p172_p10), %vm470_vm0, %v5581_v2, 0  ;;  %v5619_v4 = vld [vmem:[%s7701_s1 + $0xa] sm:$0x3] (!%p172_p10)  ;;  %vm415_vm1 = vcmask (!%p172_p10), 31744  }
  0x10   : > { %5948 = vmatpush3.bf16.msra.mxu1 (!%p172_p10), %v472_v1  ;;  %v5467_v5 = vld [vmem:[%s7701_s1 + $0x2] sm:$0x3] (!%p172_p10)  ;;  %6100 = vmatpush3.bf16.msra.mxu0 (!%p172_p10), %v6989_v3  ;;  %vm2537_vm2 = vsmask.f32 (!%p172_p10), 6400  ;;  %v7009_v7 = vld [vmem:[%s7701_s1 + $0x4] sm:$0x3] (!%p172_p10) }
  0x11   : > { %6580 = vmatprep.subr.msk.bf16.mxu1 (!%p172_p10), %vm470_vm0, %v5467_v5  ;;  %6585 = vmatprep.subr.msk.bf16.mxu0 (!%p172_p10), %vm470_vm0, %v5619_v4  ;;  %v1095_v9 = vsel (!%p172_p10), %vm470_vm0, %v5467_v5, 0  ;;  %v3275_v18 = vsel (!%p172_p10), %vm470_vm0, %v5619_v4, 0  ;;  %v7034_v40 = vld [vmem:[%s7701_s1 + $0xc] sm:$0x3] (!%p172_p10)  ;;  %vm3182_vm3 = vcmask (!%p172_p10), 1045504   ;;  %vm1514_vm5 = vcmask (!%p172_p10), 1046528  }
  0x12   : > { %vm891_vm4 = vsmask.f32 (!%p172_p10), 7424  ;;  %vm4205_vm6 = vsmask.f32 (!%p172_p10), 5376  ;;  %vm4850_vm7 = vcmask (!%p172_p10), 1044480   ;;  %s199_s7 = sand.u32 (!%p172_p10), 1, %s6881_s13  }
  0x13   : > { %s5775_s18 = smul.u32 (!%p172_p10), 4608, %s6889_s15  ;;  %s7654_s26 = scalar_lea.sflag (!%p172_p10), [#allocation4], %s199_s7 }
  0x14   : > { %s6899_s28 = smov (!%p172_p10), [#allocation3]  }
  0x15   : > { %s6823_s29 = sshll.u32 (!%p172_p10), %s6899_s28, 4  ;;  %s6824_s29 = int_to_ptr.vmem [resolvable:$false] %s6823_s29 }
  0x16   : > { %s203_s30 = scalar_select %p202_p11, %s6889_s15, 1 }
  0x17   : > { %s7644_s15 = scalar_lea.hbm %s7703_s3, %s5775_s18 }
  0x18   : > { %s6590_s8 = smul.u32 164, %s203_s30  ;;  %s6825_s30 = scalar_lea.vmem %s6824_s29, 9216 }
  0x1a   : > { %s7003_s11 = scalar_lea.vmem %s7700_s0, %s6590_s8  ;;  %s6589_s8 = smul.u32 288, %s199_s7 }
  0x1b   : > { %v6648_v6 = vld [vmem:[%s7003_s11] sm:$0xff]   ;;  %v6649_v8 = vld [vmem:[%s7003_s11 + $0x8] sm:$0xff]   ;;  %v6651_v11 = vld [vmem:[%s7003_s11 + $0x10] sm:$0xff]  }
  0x1c   : > { %5949 = vmatprep.mubr.msk.bf16.mxu1 %vm415_vm1, %v6648_v6  ;;  %v6650_v10 = vld [vmem:[%s7003_s11 + $0x8] sm:$0xfe]   ;;  %v6652_v12 = vld [vmem:[%s7003_s11 + $0x10] sm:$0xff]   ;;  %v2547_v15 = vshrl.u32 %v6651_v11, 16  ;;  %v2550_v16 = vshll.u32 %v6651_v11, 16  ;;  %v6653_v17 = vld [vmem:[%s7003_s11 + $0x18] sm:$0xff]  }
  0x1d   : > { %5950 = vmatmul.mubr.msk.bf16.vlgmr.msra.gmra.mrb[0].mxu1 %vm415_vm1, %v6649_v8  ;;  %v2539_v13 = vshrl.u32 %v6650_v10, 16  ;;  %v2542_v14 = vshll.u32 %v6650_v10, 16  ;;  %v2556_v23 = vshrl.u32 %v6653_v17, 16  ;;  %v2559_v24 = vshll.u32 %v6653_v17, 16  ;;  %v6654_v25 = vld [vmem:[%s7003_s11 + $0x18] sm:$0xff]   ;;  %v6655_v26 = vld [vmem:[%s7003_s11 + $0x20] sm:$0xff]  }
  0x1e   : > { %5986 = vmatpush3.bf16.msra.mxu1 %v1095_v9  ;;  %5953 = vmatprep.mubr.msk.bf16.mxu1 %vm415_vm1, %v6652_v12  ;;  %v2549_v21 = vrot.slane %v2547_v15, 1  ;;  %v2552_v22 = vrot.slane %v2550_v16, 2  ;;  %v2565_v31 = vshrl.u32 %v6655_v26, 16  ;;  %v2568_v32 = vshll.u32 %v6655_v26, 16  ;;  %v6656_v33 = vld [vmem:[%s7003_s11 + $0x20] sm:$0xff]   ;;  %v6657_v34 = vld [vmem:[%s7003_s11 + $0x28] sm:$0xff]  }
  0x1f   : > { %6581 = vmatprep.subr.msk.bf16.mxu1 %vm470_vm0, %v7009_v7  ;;  %v2541_v19 = vrot.slane %v2539_v13, 1  ;;  %v2544_v20 = vrot.slane %v2542_v14, 2  ;;  %v2558_v29 = vrot.slane %v2556_v23, 1  ;;  %v2561_v30 = vrot.slane %v2559_v24, 2  ;;  %v6658_v42 = vld [vmem:[%s7003_s11 + $0x28] sm:$0xff]   ;;  %v6659_v43 = vld [vmem:[%s7003_s11 + $0x30] sm:$0xff]  }
  0x20   : > { %v2553_v28 = vor.u32 %v2552_v22, %v2549_v21  ;;  %v2567_v37 = vrot.slane %v2565_v31, 1  ;;  %v2570_v38 = vrot.slane %v2568_v32, 2  ;;  %v2574_v39 = vshrl.u32 %v6657_v34, 16  ;;  %v6660_v47 = vld [vmem:[%s7003_s11 + $0x30] sm:$0xff]   ;;  %v6661_v51 = vld [vmem:[%s7003_s11 + $0x38] sm:$0xff]   ;;  %v6663_v58 = vld [vmem:[%s7003_s11 + $0x40] sm:$0xff]  }
  0x21   : > { %v2545_v27 = vor.u32 %v2544_v20, %v2541_v19  ;;  %v2562_v36 = vor.u32 %v2561_v30, %v2558_v29  ;;  %v2577_v41 = vshll.u32 %v6657_v34, 16  ;;  %v2583_v49 = vshrl.u32 %v6659_v43, 16  ;;  %v6665_v1 = vld [vmem:[%s7003_s11 + $0x48] sm:$0xff]   ;;  %v6662_v4 = vld [vmem:[%s7003_s11 + $0x38] sm:$0xff]   ;;  %v6667_v8 = vld [vmem:[%s7003_s11 + $0x50] sm:$0xff]  }
  0x22   : > { %v2571_v45 = vor.u32 %v2570_v38, %v2567_v37  ;;  %v2576_v46 = vrot.slane %v2574_v39, 1  ;;  %v2586_v50 = vshll.u32 %v6659_v43, 16  ;;  %v2592_v56 = vshrl.u32 %v6661_v51, 16  ;;  %v6664_v12 = vld [vmem:[%s7003_s11 + $0x40] sm:$0xff]   ;;  %v6666_v23 = vld [vmem:[%s7003_s11 + $0x48] sm:$0xff]   ;;  %v6668_v24 = vld [vmem:[%s7003_s11 + $0x50] sm:$0xff]  }
  0x23   : > { %v2554_v35 = vsel %vm2537_vm2, %v2545_v27, %v2553_v28  ;;  %v2563_v44 = vsel %vm2537_vm2, %v2553_v28, %v2562_v36  ;;  %v2579_v48 = vrot.slane %v2577_v41, 2  ;;  %v2585_v54 = vrot.slane %v2583_v49, 1  ;;  %v6672_v29 = vld [vmem:[%s7003_s11 + $0x10] sm:$0xff]   ;;  %v6671_v34 = vld [vmem:[%s7003_s11 + $0x8] sm:$0xfc]   ;;  %v6673_v37 = vld [vmem:[%s7003_s11 + $0x60] sm:$0xff]  }
  0x24   : > { %6101 = vmatprep.mubr.msk.bf16.mxu0 %vm415_vm1, %v2554_v35  ;;  %v2572_v52 = vsel %vm2537_vm2, %v2562_v36, %v2571_v45  ;;  %v2588_v55 = vrot.slane %v2586_v50, 2  ;;  %v2595_v57 = vshll.u32 %v6661_v51, 16  ;;  %v2594_v60 = vrot.slane %v2592_v56, 1  ;;  %v6670_v35 = vld [vmem:[%s7003_s11 + $0x58] sm:$0xff]   ;;  %v6685_v49 = vld [vmem:[%s7003_s11] sm:$0xff]   ;;  %v6678_v50 = vld [vmem:[%s7003_s11 + $0x28] sm:$0xff]  }
  0x25   : > { %5954 = vmatmul.mubr.msk.bf16.gmra.mrb[4].mxu1 %vm415_vm1, %v6654_v25  ;;  %6102 = vmatmul.mubr.msk.bf16.vlgmr.msra.gmra.mrb[0].mxu0 %vm415_vm1, %v2563_v44  ;;  %v2580_v53 = vor.u32 %v2579_v48, %v2576_v46  ;;  %v2601_v63 = vshrl.u32 %v6663_v58, 16  ;;  %v2604_v0 = vshll.u32 %v6663_v58, 16  ;;  %v2610_v9 = vshrl.u32 %v6665_v1, 16  ;;  %v6676_v44 = vld [vmem:[%s7003_s11 + $0x20] sm:$0xff]  }
  0x26   : > { %5957 = vmatprep.mubr.msk.bf16.mxu1 %vm415_vm1, %v6656_v33  ;;  %6138 = vmatpush3.bf16.msra.mxu0 %v3275_v18  ;;  %v2589_v59 = vor.u32 %v2588_v55, %v2585_v54  ;;  %v2597_v62 = vrot.slane %v2595_v57, 2  ;;  %v2613_v10 = vshll.u32 %v6665_v1, 16  ;;  %v2619_v14 = vshrl.u32 %v6667_v8, 16  ;;  %v6669_v18 = vld [vmem:[%s7003_s11 + $0x58] sm:$0xff]   ;;  %v6680_v55 = vld [vmem:[%s7003_s11 + $0x30] sm:$0xff]  }
  0x27   : > { %6105 = vmatprep.mubr.msk.bf16.mxu0 %vm415_vm1, %v2572_v52  ;;  %6586 = vmatprep.subr.msk.bf16.mxu0 %vm470_vm0, %v7034_v40  ;;  %v2581_v61 = vsel %vm2537_vm2, %v2571_v45, %v2580_v53  ;;  %v2603_v5 = vrot.slane %v2601_v63, 1  ;;  %v2606_v6 = vrot.slane %v2604_v0, 2  ;;  %v2622_v15 = vshll.u32 %v6667_v8, 16  ;;  %v6675_v45 = vld [vmem:[%s7003_s11 + $0x68] sm:$0xff]   ;;  %v6682_v0 = vld [vmem:[%s7003_s11 + $0x38] sm:$0xff]   ;;  %v6688_v1 = vld [vmem:[%s7003_s11 + $0x10] sm:$0xff]  }
  0x28   : > { %v2590_v2 = vsel %vm2537_vm2, %v2580_v53, %v2589_v59  ;;  %v2598_v11 = vor.u32 %v2597_v62, %v2594_v60  ;;  %v2612_v16 = vrot.slane %v2610_v9, 1  ;;  %v2615_v17 = vrot.slane %v2613_v10, 2  ;;  %v6686_v53 = vld [vmem:[%s7003_s11 + $0x8] sm:$0xff]  }
  0x29   : > { %v2607_v13 = vor.u32 %v2606_v6, %v2603_v5  ;;  %v2621_v21 = vrot.slane %v2619_v14, 1  ;;  %v2624_v22 = vrot.slane %v2622_v15, 2  ;;  %v2628_v26 = vshrl.u32 %v6669_v18, 16  ;;  %v7102_v57 = vld [vmem:[%s7701_s1 + $0xe] sm:$0x3]  ;;  %v6690_v6 = vld [vmem:[%s7003_s11 + $0x18] sm:$0xff]  }
  0x2a   : > { %v2599_v19 = vsel %vm2537_vm2, %v2589_v59, %v2598_v11  ;;  %v2616_v25 = vor.u32 %v2615_v17, %v2612_v16  ;;  %v2631_v27 = vshll.u32 %v6669_v18, 16  ;;  %v3183_v38 = vrot.slane %v6671_v34, 2  ;;  %v6679_v59 = vld [vmem:[%s7003_s11 + $0x78] sm:$0xff]   ;;  %v6683_v10 = vld [vmem:[%s7003_s11 + $0x88] sm:$0xff]  }
  0x2b   : > { %v2608_v20 = vsel %vm2537_vm2, %v2598_v11, %v2607_v13  ;;  %v2625_v28 = vor.u32 %v2624_v22, %v2621_v21  ;;  %v2630_v31 = vrot.slane %v2628_v26, 1  ;;  %v3184_v39 = vrot.slane %v6672_v29, 2  ;;  %v6687_v18 = vld [vmem:[%s7003_s11 + $0x48] sm:$0xff]  }
  0x2c   : > { %v2617_v30 = vsel %vm2537_vm2, %v2607_v13, %v2616_v25  ;;  %v2633_v32 = vrot.slane %v2631_v27, 2  ;;  %v3188_v48 = vrot.slane %v6676_v44, 2  ;;  %v3786_v52 = vsel %vm470_vm0, %v7034_v40, 0  ;;  %v6681_v40 = vld [vmem:[%s7003_s11 + $0x80] sm:$0xff]   ;;  %v6694_v27 = vld [vmem:[%s7003_s11 + $0x28] sm:$0xff]   ;;  %v6698_v44 = vld [vmem:[%s7003_s11 + $0x38] sm:$0xff]  }
  0x2d   : > { %5958 = vmatmul.mubr.msk.bf16.gmra.mrb[8].mxu1 %vm415_vm1, %v6658_v42  ;;  %6106 = vmatmul.mubr.msk.bf16.gmra.mrb[4].mxu0 %vm415_vm1, %v2581_v61  ;;  %v2626_v33 = vsel %vm2537_vm2, %v2616_v25, %v2625_v28  ;;  %v6674_v42 = vld [vmem:[%s7003_s11 + $0x18] sm:$0xff]   ;;  %v3185_v43 = vsel %vm3182_vm3, %v3183_v38, %v3184_v39  ;;  %v895_v56 = vshll.u32 %v6685_v49, 16  ;;  %v3190_v58 = vrot.slane %v6678_v50, 2 }
  0x2e   : > { %5961 = vmatprep.mubr.msk.bf16.mxu1 %vm415_vm1, %v6660_v47  ;;  %6109 = vmatprep.mubr.msk.bf16.mxu0 %vm415_vm1, %v2590_v2  ;;  %v7075_v36 = vor.u32 %v2633_v32, %v2630_v31  ;;  %v3186_v46 = vrot.slane %v6674_v42, 2  ;;  %v6677_v47 = vld [vmem:[%s7003_s11 + $0x70] sm:$0xff]   ;;  %v900_v60 = vshll.u32 %v6686_v53, 16  ;;  %v3192_v61 = vrot.slane %v6680_v55, 2  ;;  %v6691_v38 = vld [vmem:[%s7003_s11 + $0x58] sm:$0xff]  }
  0x2f   : > { %v893_v62 = vshrl.u32 %v6685_v49, 16  ;;  %v897_v63 = vrot.slane %v895_v56, 1  ;;  %v3191_v2 = vsel %vm3182_vm3, %v3188_v48, %v3190_v58  ;;  %v908_v11 = vshll.u32 %v6688_v1, 16  ;;  %v6695_v56 = vld [vmem:[%s7003_s11 + $0x68] sm:$0xff]  }
  0x30   : > { %v2635_v41 = vsel %vm2537_vm2, %v2625_v28, %v7075_v36  ;;  %v3187_v51 = vsel %vm3182_vm3, %v3184_v39, %v3186_v46  ;;  %v3189_v54 = vsel %vm3182_vm3, %v3186_v46, %v3188_v48  ;;  %v902_v5 = vrot.slane %v900_v60, 1 }
  0x31   : > { %v3193_v8 = vsel %vm3182_vm3, %v3190_v58, %v3192_v61  ;;  %v898_v9 = vor.u32 %v897_v63, %v893_v62  ;;  %v904_v13 = vshrl.u32 %v6686_v53, 16  ;;  %v912_v16 = vshrl.u32 %v6688_v1, 16  ;;  %v6702_v1 = vld [vmem:[%s7003_s11 + $0x48] sm:$0xff]  }
  0x32   : > { %v916_v17 = vshll.u32 %v6690_v6, 16  ;;  %v1607_v28 = vsel %vm470_vm0, %v7009_v7, 0  ;;  %v3198_v29 = vrot.slane %v6687_v18, 2  ;;  %v6693_v7 = vld [vmem:[%s7003_s11 + $0x60] sm:$0xff]   ;;  %v3202_v48 = vrot.slane %v6691_v38, 2 }
  0x33   : > { %v903_v15 = vsel %vm891_vm4, %v898_v9, %v902_v5  ;;  %v906_v22 = vor.u32 %v904_v13, %v902_v5  ;;  %v3204_v49 = vrot.slane %v6693_v7, 2 }
  0x34   : > { %v918_v26 = vrot.slane %v916_v17, 1  ;;  %v6701_v17 = vld [vmem:[%s7003_s11 + $0x80] sm:$0xff]  }
  0x35   : > { %5962 = vmatmul.mubr.msk.bf16.gmra.mrb[12].mxu1 %vm415_vm1, %v6662_v4  ;;  %6110 = vmatmul.mubr.msk.bf16.gmra.mrb[8].mxu0 %vm415_vm1, %v2599_v19  ;;  %v6684_v4 = vld [vmem:[%s7003_s11 + $0x40] sm:$0xff]   ;;  %v910_v19 = vrot.slane %v908_v11, 1  ;;  %v3205_v62 = vsel %vm3182_vm3, %v3202_v48, %v3204_v49  ;;  %v964_v11 = vshll.u32 %v6702_v1, 16 }
  0x36   : > { %5965 = vmatprep.mubr.msk.bf16.mxu1 %vm415_vm1, %v6664_v12  ;;  %6113 = vmatprep.mubr.msk.bf16.mxu0 %vm415_vm1, %v2608_v20  ;;  %v3194_v12 = vrot.slane %v6682_v0, 2  ;;  %v3196_v14 = vrot.slane %v6684_v4, 2  ;;  %v6692_v20 = vld [vmem:[%s7003_s11 + $0x20] sm:$0xff]  }
  0x37   : > { %v914_v25 = vor.u32 %v912_v16, %v910_v19  ;;  %v911_v31 = vsel %vm891_vm4, %v906_v22, %v910_v19  ;;  %v7171_v22 = vld [vmem:[%s7701_s1 + $0x6] sm:$0x3] }
  0x38   : > { %v3195_v21 = vsel %vm3182_vm3, %v3192_v61, %v3194_v12  ;;  %v3199_v42 = vsel %vm3182_vm3, %v3196_v14, %v3198_v29  ;;  %v6697_v61 = vld [vmem:[%s7003_s11 + $0x70] sm:$0xff]  }
  0x39   : > { %v919_v34 = vsel %vm891_vm4, %v914_v25, %v918_v26 }
  0x3d   : > { %5966 = vmatmul.mubr.msk.bf16.gmra.mrb[16].mxu1 %vm415_vm1, %v6666_v23  ;;  %6114 = vmatmul.mubr.msk.bf16.gmra.mrb[12].mxu0 %vm415_vm1, %v2617_v30  ;;  %v6689_v23 = vld [vmem:[%s7003_s11 + $0x50] sm:$0xff]   ;;  %v924_v30 = vshll.u32 %v6692_v20, 16 }
  0x3e   : > { %5969 = vmatprep.mubr.msk.bf16.mxu1 %vm415_vm1, %v6668_v24  ;;  %6117 = vmatprep.mubr.msk.bf16.mxu0 %vm415_vm1, %v2626_v33  ;;  %v3197_v24 = vsel %vm3182_vm3, %v3194_v12, %v3196_v14  ;;  %v3200_v32 = vrot.slane %v6689_v23, 2  ;;  %v920_v33 = vshrl.u32 %v6690_v6, 16  ;;  %v3208_v6 = vrot.slane %v6697_v61, 2  ;;  %v6699_v12 = vld [vmem:[%s7003_s11 + $0x78] sm:$0xff]   ;;  %v6704_v14 = vld [vmem:[%s7003_s11 + $0x50] sm:$0xff]  }
  0x3f   : > { %v926_v39 = vrot.slane %v924_v30, 1  ;;  %v972_v23 = vshll.u32 %v6704_v14, 16 }
  0x45   : > { %5970 = vmatmul.mubr.msk.bf16.gmra.mrb[20].mxu1 %vm415_vm1, %v6670_v35  ;;  %6118 = vmatmul.mubr.msk.bf16.gmra.mrb[16].mxu0 %vm415_vm1, %v2635_v41  ;;  %v928_v35 = vshrl.u32 %v6692_v20, 16  ;;  %v6696_v41 = vld [vmem:[%s7003_s11 + $0x30] sm:$0xff]   ;;  %v966_v20 = vrot.slane %v964_v11, 1  ;;  %v6712_v11 = vld [vmem:[%s7003_s11 + $0x20] sm:$0xff]  }
  0x46   : > { %5973 = vmatprep.mubr.msk.bf16.mxu1 %vm415_vm1, %v6673_v37  ;;  %6139 = vmatprep.mubr.msk.bf16.mxu0 %vm415_vm1, %v3185_v43  ;;  %v932_v37 = vshll.u32 %v6694_v27, 16  ;;  %v922_v43 = vor.u32 %v920_v33, %v918_v26  ;;  %v940_v50 = vshll.u32 %v6696_v41, 16  ;;  %v944_v53 = vshrl.u32 %v6696_v41, 16  ;;  %v6708_v33 = vld [vmem:[%s7003_s11 + $0x60] sm:$0xff]   ;;  %v6711_v41 = vld [vmem:[%s7003_s11 + $0x68] sm:$0xff]  }
  0x47   : > { %v930_v46 = vor.u32 %v928_v35, %v926_v39  ;;  %v3212_v26 = vrot.slane %v6701_v17, 2  ;;  %v6719_v17 = vld [vmem:[%s7003_s11 + $0x88] sm:$0xff]  }
  0x48   : > { %v942_v58 = vrot.slane %v940_v50, 1  ;;  %v996_v50 = vshll.u32 %v6711_v41, 16 }
  0x4a   : > { %v946_v63 = vor.u32 %v944_v53, %v942_v58 }
  0x4d   : > { %5974 = vmatmul.mubr.msk.bf16.gmra.mrb[24].mxu1 %vm415_vm1, %v6675_v45  ;;  %6140 = vmatmul.mubr.msk.bf16.vlgmr.msra.gmra.mrb[0].mxu0 %vm415_vm1, %v3187_v51  ;;  %v3201_v45 = vsel %vm3182_vm3, %v3198_v29, %v3200_v32  ;;  %v927_v51 = vsel %vm891_vm4, %v922_v43, %v926_v39  ;;  %v976_v29 = vshrl.u32 %v6704_v14, 16  ;;  %v988_v43 = vshll.u32 %v6708_v33, 16 }
  0x4e   : > { %5977 = vmatprep.mubr.msk.bf16.mxu1 %vm415_vm1, %v6677_v47  ;;  %6176 = vmatpush3.bf16.msra.mxu0 %v3786_v52  ;;  %v934_v47 = vrot.slane %v932_v37, 1  ;;  %v936_v52 = vshrl.u32 %v6694_v27, 16  ;;  %v968_v27 = vshrl.u32 %v6702_v1, 16  ;;  %v6705_v37 = vld [vmem:[%s7003_s11 + $0x90] sm:$0xff]   ;;  %v1000_v1 = vshrl.u32 %v6711_v41, 16 }
  0x4f   : > { %6143 = vmatprep.mubr.msk.bf16.mxu0 %vm415_vm1, %v3189_v54  ;;  %6587 = vmatprep.subr.msk.bf16.mxu0 %vm470_vm0, %v7102_v57  ;;  %v948_v54 = vshll.u32 %v6698_v44, 16 }
  0x50   : > { %v935_v55 = vsel %vm891_vm4, %v930_v46, %v934_v47  ;;  %v938_v60 = vor.u32 %v936_v52, %v934_v47  ;;  %v970_v35 = vor.u32 %v968_v27, %v966_v20  ;;  %v6713_v52 = vld [vmem:[%s7003_s11 + $0x70] sm:$0xff]  }
  0x51   : > { %v950_v0 = vrot.slane %v948_v54, 1  ;;  %v6716_v27 = vld [vmem:[%s7003_s11 + $0x30] sm:$0xff]  }
  0x52   : > { %v943_v5 = vsel %vm891_vm4, %v938_v60, %v942_v58  ;;  %v6709_v58 = vld [vmem:[%s7003_s11 + $0x10] sm:$0xfc]   ;;  %v6715_v60 = vld [vmem:[%s7003_s11 + $0x78] sm:$0xff]  }
  0x53   : > { %v951_v9 = vsel %vm891_vm4, %v946_v63, %v950_v0 }
  0x55   : > { %5978 = vmatmul.mubr.msk.bf16.gmra.mrb[28].mxu1 %vm415_vm1, %v6679_v59  ;;  %6144 = vmatmul.mubr.msk.bf16.gmra.mrb[4].mxu0 %vm415_vm1, %v3191_v2  ;;  %v6700_v59 = vld [vmem:[%s7003_s11 + $0x40] sm:$0xff]   ;;  %v3206_v2 = vrot.slane %v6695_v56, 2 }
  0x56   : > { %5981 = vmatprep.mubr.msk.bf16.mxu1 %vm415_vm1, %v6681_v40  ;;  %6147 = vmatprep.mubr.msk.bf16.mxu0 %vm415_vm1, %v3193_v8  ;;  %v3203_v40 = vsel %vm3182_vm3, %v3200_v32, %v3202_v48  ;;  %v956_v4 = vshll.u32 %v6700_v59, 16  ;;  %v952_v8 = vshrl.u32 %v6698_v44, 16  ;;  %v974_v32 = vrot.slane %v972_v23, 1  ;;  %v6707_v48 = vld [vmem:[%s7003_s11 + $0x98] ss:$0 sps:$4 sm:$0x33]  }
  0x57   : > { %v3209_v18 = vsel %vm3182_vm3, %v3206_v2, %v3208_v6  ;;  %v3218_v61 = vrot.slane %v6707_v48, 2  ;;  %v1016_v23 = vshrl.u32 %v6715_v60, 16 }
  0x58   : > { %v958_v13 = vrot.slane %v956_v4, 1  ;;  %v954_v16 = vor.u32 %v952_v8, %v950_v0  ;;  %v978_v39 = vor.u32 %v976_v29, %v974_v32  ;;  %v975_v44 = vsel %vm891_vm4, %v970_v35, %v974_v32  ;;  %v6717_v8 = vld [vmem:[%s7003_s11 + $0x80] sm:$0xff]   ;;  %v6721_v29 = vld [vmem:[%s7003_s11 + $0x90] ss:$0 sps:$4 sm:$0x11]   ;;  %v6718_v32 = vld [vmem:[%s7003_s11 + $0x38] sm:$0xff]  }
  0x59   : > { %v3703_v41 = vrot.slane %v6718_v32, 2  ;;  %v6738_v32 = vld [vmem:[%s7003_s11 + $0x40] sm:$0xff]  }
  0x5a   : > { %v959_v25 = vsel %vm891_vm4, %v954_v16, %v958_v13 }
  0x5d   : > { %5982 = vmatmul.mubr.msk.bf16.gmra.mrb[32].mxu1 %vm415_vm1, %v6683_v10  ;;  %6148 = vmatmul.mubr.msk.bf16.gmra.mrb[8].mxu0 %vm415_vm1, %v3195_v21  ;;  %v960_v10 = vshrl.u32 %v6700_v59, 16  ;;  %v6706_v21 = vld [vmem:[%s7003_s11 + $0x58] sm:$0xff]  }
  0x5e   : > { %5987 = vmatprep.mubr.msk.bf16.mxu1 %vm415_vm1, %v903_v15  ;;  %6151 = vmatprep.mubr.msk.bf16.mxu0 %vm415_vm1, %v3197_v24  ;;  %v3207_v15 = vsel %vm3182_vm3, %v3204_v49, %v3206_v2  ;;  %v3210_v24 = vrot.slane %v6699_v12, 2  ;;  %v980_v30 = vshll.u32 %v6706_v21, 16  ;;  %v984_v46 = vshrl.u32 %v6706_v21, 16 }
  0x5f   : > { %v962_v19 = vor.u32 %v960_v10, %v958_v13  ;;  %v992_v49 = vshrl.u32 %v6708_v33, 16  ;;  %v3694_v2 = vrot.slane %v6709_v58, 2  ;;  %v6714_v13 = vld [vmem:[%s7003_s11 + $0x28] sm:$0xff]   ;;  %v4431_v33 = vsel %vm470_vm0, %v7102_v57, 0 }
  0x60   : > { %v3213_v38 = vsel %vm3182_vm3, %v3210_v24, %v3212_v26  ;;  %v982_v7 = vrot.slane %v980_v30, 1  ;;  %v3699_v21 = vrot.slane %v6714_v13, 2 }
  0x62   : > { %v983_v47 = vsel %vm891_vm4, %v978_v39, %v982_v7  ;;  %v986_v54 = vor.u32 %v984_v46, %v982_v7  ;;  %v1036_v39 = vshll.u32 %v6721_v29, 16  ;;  %v3701_v7 = vrot.slane %v6716_v27, 2  ;;  %v6720_v46 = vld [vmem:[%s7003_s11 + $0x40] sm:$0xff]  }
  0x64   : > { %v3702_v48 = vsel %vm3182_vm3, %v3699_v21, %v3701_v7 }
  0x65   : > { %5988 = vmatmul.mubr.msk.bf16.vlgmr.msra.gmra.mrb[0].mxu1 %vm415_vm1, %v911_v31  ;;  %6152 = vmatmul.mubr.msk.bf16.gmra.mrb[12].mxu0 %vm415_vm1, %v3199_v42  ;;  %v6703_v31 = vld [vmem:[%s7003_s11 + $0x88] sm:$0xff]  }
  0x66   : > { %5991 = vmatprep.mubr.msk.bf16.mxu1 %vm415_vm1, %v919_v34  ;;  %6024 = vmatpush3.bf16.msra.mxu1 %v1607_v28  ;;  %v967_v28 = vsel %vm891_vm4, %v962_v19, %v966_v20  ;;  %v3211_v34 = vsel %vm3182_vm3, %v3208_v6, %v3210_v24  ;;  %v3214_v42 = vrot.slane %v6703_v31, 2  ;;  %v1012_v6 = vshll.u32 %v6715_v60, 16  ;;  %v6725_v60 = vld [vmem:[%s7003_s11 + $0x50] sm:$0xff]  }
  0x67   : > { %6155 = vmatprep.mubr.msk.bf16.mxu0 %vm415_vm1, %v3201_v45  ;;  %6582 = vmatprep.subr.msk.bf16.mxu1 %vm470_vm0, %v7171_v22  ;;  %v3216_v45 = vrot.slane %v6705_v37, 2  ;;  %v3697_v19 = vrot.slane %v6712_v11, 2 }
  0x68   : > { %v3215_v53 = vsel %vm3182_vm3, %v3212_v26, %v3214_v42  ;;  %v1014_v16 = vrot.slane %v1012_v6, 1  ;;  %v1028_v26 = vshll.u32 %v6719_v17, 16  ;;  %v6730_v6 = vld [vmem:[%s7003_s11 + $0x20] sm:$0xff]  }
  0x69   : > { %v3217_v56 = vsel %vm3182_vm3, %v3214_v42, %v3216_v45  ;;  %v3219_v10 = vsel %vm3182_vm3, %v3216_v45, %v3218_v61  ;;  %v1032_v42 = vshrl.u32 %v6719_v17, 16  ;;  %v6723_v45 = vld [vmem:[%s7003_s11] sm:$0xfe]   ;;  %v1522_v13 = vrot.slane %v6730_v6, 1 }
  0x6a   : > { %v1018_v31 = vor.u32 %v1016_v23, %v1014_v16  ;;  %v1030_v37 = vrot.slane %v1028_v26, 1  ;;  %v6736_v23 = vld [vmem:[%s7003_s11 + $0x38] sm:$0xff]   ;;  %v6750_v6 = vld [vmem:[%s7003_s11 + $0x20] sm:$0xff]  }
  0x6b   : > { %v1528_v29 = vrot.slane %v6736_v23, 1 }
  0x6d   : > { %5992 = vmatmul.mubr.msk.bf16.gmra.mrb[4].mxu1 %vm415_vm1, %v927_v51  ;;  %6156 = vmatmul.mubr.msk.bf16.gmra.mrb[16].mxu0 %vm415_vm1, %v3203_v40  ;;  %v990_v51 = vrot.slane %v988_v43, 1  ;;  %v998_v40 = vrot.slane %v996_v50, 1  ;;  %v6724_v43 = vld [vmem:[%s7003_s11 + $0x8] sm:$0xff]   ;;  %v3704_v50 = vsel %vm3182_vm3, %v3701_v7, %v3703_v41  ;;  %v1530_v7 = vrot.slane %v6738_v32, 1 }
  0x6e   : > { %5995 = vmatprep.mubr.msk.bf16.mxu1 %vm415_vm1, %v935_v55  ;;  %6159 = vmatprep.mubr.msk.bf16.mxu0 %vm415_vm1, %v3205_v62  ;;  %v6710_v55 = vld [vmem:[%s7003_s11 + $0x18] sm:$0xff]   ;;  %v1004_v62 = vshll.u32 %v6713_v52, 16 }
  0x6f   : > { %v994_v59 = vor.u32 %v992_v49, %v990_v51  ;;  %v991_v63 = vsel %vm891_vm4, %v986_v54, %v990_v51  ;;  %v3695_v0 = vrot.slane %v6710_v55, 2  ;;  %v1002_v12 = vor.u32 %v1000_v1, %v998_v40  ;;  %v6722_v51 = vld [vmem:[%s7003_s11 + $0x48] sm:$0xff]  }
  0x70   : > { %v1034_v49 = vor.u32 %v1032_v42, %v1030_v37  ;;  %v3705_v54 = vrot.slane %v6720_v46, 2  ;;  %v3707_v58 = vrot.slane %v6722_v51, 2 }
  0x71   : > { %v999_v4 = vsel %vm891_vm4, %v994_v59, %v998_v40  ;;  %v3696_v14 = vsel %vm3182_vm3, %v3694_v2, %v3695_v0  ;;  %v3698_v30 = vsel %vm3182_vm3, %v3695_v0, %v3697_v19  ;;  %v6728_v40 = vld [vmem:[%s7003_s11 + $0x18] sm:$0xff]   ;;  %v3709_v2 = vrot.slane %v6725_v60, 2 }
  0x72   : > { %v3706_v61 = vsel %vm3182_vm3, %v3703_v41, %v3705_v54  ;;  %v3708_v0 = vsel %vm3182_vm3, %v3705_v54, %v3707_v58  ;;  %v1520_v1 = vrot.slane %v6728_v40, 1  ;;  %v6739_v41 = vld [vmem:[%s7003_s11 + $0x88] sm:$0xff]   ;;  %v6743_v54 = vld [vmem:[%s7003_s11 + $0x98] sm:$0xff]  }
  0x73   : > { %v3710_v11 = vsel %vm3182_vm3, %v3707_v58, %v3709_v2  ;;  %v3723_v46 = vrot.slane %v6739_v41, 2  ;;  %v6746_v58 = vld [vmem:[%s7003_s11 + $0x60] sm:$0xff]   ;;  %v6749_v40 = vld [vmem:[%s7003_s11 + $0x68] sm:$0xff]  }
  0x75   : > { %5996 = vmatmul.mubr.msk.bf16.gmra.mrb[8].mxu1 %vm415_vm1, %v943_v5  ;;  %6160 = vmatmul.mubr.msk.bf16.gmra.mrb[20].mxu0 %vm415_vm1, %v3207_v15  ;;  %v1008_v5 = vshrl.u32 %v6713_v52, 16  ;;  %v1515_v52 = vrot.slane %v6723_v45, 1  ;;  %v6742_v45 = vld [vmem:[%s7003_s11 + $0x50] sm:$0xff]  }
  0x76   : > { %5999 = vmatprep.mubr.msk.bf16.mxu1 %vm415_vm1, %v951_v9  ;;  %6163 = vmatprep.mubr.msk.bf16.mxu0 %vm415_vm1, %v3209_v18  ;;  %v1006_v9 = vrot.slane %v1004_v62, 1  ;;  %v1020_v18 = vshll.u32 %v6717_v8, 16  ;;  %v1534_v51 = vrot.slane %v6742_v45, 1 }
  0x78   : > { %v1010_v15 = vor.u32 %v1008_v5, %v1006_v9  ;;  %v1007_v20 = vsel %vm891_vm4, %v1002_v12, %v1006_v9  ;;  %v6732_v9 = vld [vmem:[%s7003_s11 + $0x28] sm:$0xff]   ;;  %v6729_v12 = vld [vmem:[%s7003_s11 + $0x60] sm:$0xff]  }
  0x79   : > { %v3713_v17 = vrot.slane %v6729_v12, 2  ;;  %v6752_v12 = vld [vmem:[%s7003_s11 + $0x28] sm:$0xff]  }
  0x7a   : > { %v1015_v24 = vsel %vm891_vm4, %v1010_v15, %v1014_v16  ;;  %v6731_v15 = vld [vmem:[%s7003_s11 + $0x68] sm:$0xff]   ;;  %v1524_v16 = vrot.slane %v6732_v9, 1 }
  0x7d   : > { %6000 = vmatmul.mubr.msk.bf16.gmra.mrb[12].mxu1 %vm415_vm1, %v959_v25  ;;  %6164 = vmatmul.mubr.msk.bf16.gmra.mrb[24].mxu0 %vm415_vm1, %v3211_v34  ;;  %v1024_v25 = vshrl.u32 %v6717_v8, 16  ;;  %v3700_v34 = vsel %vm3182_vm3, %v3697_v19, %v3699_v21  ;;  %v6734_v19 = vld [vmem:[%s7003_s11 + $0x30] sm:$0xff]   ;;  %v1525_v21 = vsel %vm1514_vm5, %v1522_v13, %v1524_v16 }
  0x7e   : > { %6003 = vmatprep.mubr.msk.bf16.mxu1 %vm415_vm1, %v967_v28  ;;  %6167 = vmatprep.mubr.msk.bf16.mxu0 %vm415_vm1, %v3213_v38  ;;  %v1022_v28 = vrot.slane %v1020_v18, 1  ;;  %v7228_v38 = vld [vmem:[%s7701_s1 + $0x10] sm:$0x3]  ;;  %v1523_v18 = vsel %vm1514_vm5, %v1520_v1, %v1522_v13  ;;  %v1526_v26 = vrot.slane %v6734_v19, 1  ;;  %v4227_v19 = vshll.u32 %v6750_v6, 16 }
  0x80   : > { %v1026_v35 = vor.u32 %v1024_v25, %v1022_v28  ;;  %v1023_v57 = vsel %vm891_vm4, %v1018_v31, %v1022_v28  ;;  %v6733_v25 = vld [vmem:[%s7003_s11 + $0x70] sm:$0xff]   ;;  %v6735_v28 = vld [vmem:[%s7003_s11 + $0x78] sm:$0xff]   ;;  %v1527_v31 = vsel %vm1514_vm5, %v1524_v16, %v1526_v26 }
  0x85   : > { %6004 = vmatmul.mubr.msk.bf16.gmra.mrb[16].mxu1 %vm415_vm1, %v975_v44  ;;  %6168 = vmatmul.mubr.msk.bf16.gmra.mrb[28].mxu0 %vm415_vm1, %v3215_v53  ;;  %v1031_v44 = vsel %vm891_vm4, %v1026_v35, %v1030_v37  ;;  %v1516_v53 = vrot.slane %v6724_v43, 1  ;;  %v6740_v35 = vld [vmem:[%s7003_s11 + $0x48] sm:$0xff]  }
  0x86   : > { %6007 = vmatprep.mubr.msk.bf16.mxu1 %vm415_vm1, %v983_v47  ;;  %6171 = vmatprep.mubr.msk.bf16.mxu0 %vm415_vm1, %v3217_v56  ;;  %v1038_v47 = vrot.slane %v1036_v39, 1  ;;  %v6726_v56 = vld [vmem:[%s7003_s11 + $0x10] sm:$0xff]   ;;  %v6737_v39 = vld [vmem:[%s7003_s11 + $0x80] sm:$0xff]   ;;  %v1532_v42 = vrot.slane %v6740_v35, 1 }
  0x87   : > { %v1517_v59 = vsel %vm1514_vm5, %v1515_v52, %v1516_v53  ;;  %v1518_v62 = vrot.slane %v6726_v56, 1  ;;  %v3721_v43 = vrot.slane %v6737_v39, 2  ;;  %v6748_v52 = vld [vmem:[%s7003_s11 + $0x18] sm:$0xff]   ;;  %v6747_v56 = vld [vmem:[%s7003_s11 + $0x10] sm:$0xfc]   ;;  %v6755_v39 = vld [vmem:[%s7003_s11 + $0x80] sm:$0xff]  }
  0x88   : > { %v1039_v55 = vsel %vm891_vm4, %v1034_v49, %v1038_v47  ;;  %v1533_v47 = vsel %vm1514_vm5, %v1530_v7, %v1532_v42  ;;  %v6741_v49 = vld [vmem:[%s7003_s11 + $0x90] sm:$0xff]   ;;  %v1535_v60 = vsel %vm1514_vm5, %v1532_v42, %v1534_v51 }
  0x89   : > { %v1521_v8 = vsel %vm1514_vm5, %v1518_v62, %v1520_v1 }
  0x8d   : > { %6008 = vmatmul.mubr.msk.bf16.gmra.mrb[20].mxu1 %vm415_vm1, %v991_v63  ;;  %6172 = vmatmul.mubr.msk.bf16.gmra.mrb[32].mxu0 %vm415_vm1, %v3219_v10  ;;  %v6727_v63 = vld [vmem:[%s7003_s11 + $0x58] sm:$0xff]   ;;  %v2118_v10 = vsel %vm470_vm0, %v7171_v22, 0  ;;  %v6818_v22 = vld [vmem:[%s7701_s1 + $0x8] sm:$0x3] }
  0x8e   : > { %6011 = vmatprep.mubr.msk.bf16.mxu1 %vm415_vm1, %v999_v4  ;;  %6177 = vmatprep.mubr.msk.bf16.mxu0 %vm415_vm1, %v3696_v14  ;;  %v1519_v4 = vsel %vm1514_vm5, %v1516_v53, %v1518_v62  ;;  %v3711_v5 = vrot.slane %v6727_v63, 2  ;;  %v3724_v53 = vsel %vm3182_vm3, %v3721_v43, %v3723_v46  ;;  %v4215_v62 = vshrl.u32 %v6748_v52, 16 }
  0x8f   : > { %v4218_v63 = vshll.u32 %v6748_v52, 16 }
  0x90   : > { %v3712_v14 = vsel %vm3182_vm3, %v3709_v2, %v3711_v5  ;;  %v4207_v2 = vshrl.u32 %v6747_v56, 16  ;;  %v4217_v9 = vrot.slane %v4215_v62, 2 }
  0x95   : > { %6012 = vmatmul.mubr.msk.bf16.gmra.mrb[24].mxu1 %vm415_vm1, %v1007_v20  ;;  %6178 = vmatmul.mubr.msk.bf16.vlgmr.msra.gmra.mrb[0].mxu0 %vm415_vm1, %v3698_v30  ;;  %v3715_v20 = vrot.slane %v6731_v15, 2  ;;  %v3717_v30 = vrot.slane %v6733_v25, 2  ;;  %v4236_v25 = vshll.u32 %v6752_v12, 16 }
  0x96   : > { %6015 = vmatprep.mubr.msk.bf16.mxu1 %vm415_vm1, %v1015_v24  ;;  %6214 = vmatpush3.bf16.msra.mxu0 %v4431_v33  ;;  %v3714_v24 = vsel %vm3182_vm3, %v3711_v5, %v3713_v17  ;;  %v3719_v33 = vrot.slane %v6735_v28, 2  ;;  %v1538_v5 = vrot.slane %v6746_v58, 1  ;;  %v6754_v28 = vld [vmem:[%s7003_s11 + $0x30] sm:$0xff]  }
  0x97   : > { %6181 = vmatprep.mubr.msk.bf16.mxu0 %vm415_vm1, %v3700_v34  ;;  %6588 = vmatprep.subr.msk.bf16.mxu0 %vm470_vm0, %v7228_v38  ;;  %v3716_v27 = vsel %vm3182_vm3, %v3713_v17, %v3715_v20  ;;  %v1529_v34 = vsel %vm1514_vm5, %v1526_v26, %v1528_v29  ;;  %v3718_v37 = vsel %vm3182_vm3, %v3715_v20, %v3717_v30  ;;  %v6751_v17 = vld [vmem:[%s7003_s11 + $0x70] sm:$0xff]   ;;  %v4233_v20 = vshrl.u32 %v6752_v12, 16  ;;  %v6753_v26 = vld [vmem:[%s7003_s11 + $0x78] sm:$0xff]  }
  0x98   : > { %v4238_v35 = vrot.slane %v4236_v25, 3  ;;  %v6763_v12 = vld [vmem:[%s7003_s11 + $0x50] sm:$0xff]  }
  0x99   : > { %v4235_v32 = vrot.slane %v4233_v20, 2  ;;  %v4281_v20 = vshll.u32 %v6763_v12, 16 }
  0x9b   : > { %v4239_v45 = vor.u32 %v4238_v35, %v4235_v32  ;;  %v6767_v32 = vld [vmem:[%s7003_s11 + $0x60] sm:$0xff]  }
  0x9d   : > { %6016 = vmatmul.mubr.msk.bf16.gmra.mrb[28].mxu1 %vm415_vm1, %v1023_v57  ;;  %6182 = vmatmul.mubr.msk.bf16.gmra.mrb[4].mxu0 %vm415_vm1, %v3702_v48  ;;  %v3720_v57 = vsel %vm3182_vm3, %v3717_v30, %v3719_v33  ;;  %v6744_v48 = vld [vmem:[%s7003_s11 + $0x58] sm:$0xff]  }
  0x9e   : > { %6019 = vmatprep.mubr.msk.bf16.mxu1 %vm415_vm1, %v1031_v44  ;;  %6185 = vmatprep.mubr.msk.bf16.mxu0 %vm415_vm1, %v3704_v50  ;;  %v1531_v44 = vsel %vm1514_vm5, %v1528_v29, %v1530_v7  ;;  %v3722_v50 = vsel %vm3182_vm3, %v3719_v33, %v3721_v43  ;;  %v6756_v33 = vld [vmem:[%s7003_s11 + $0x38] sm:$0xff]   ;;  %v4242_v7 = vshrl.u32 %v6754_v28, 16 }
  0x9f   : > { %v4251_v43 = vshrl.u32 %v6756_v33, 16 }
  0xa5   : > { %6020 = vmatmul.mubr.msk.bf16.gmra.mrb[32].mxu1 %vm415_vm1, %v1039_v55  ;;  %6186 = vmatmul.mubr.msk.bf16.gmra.mrb[8].mxu0 %vm415_vm1, %v3706_v61  ;;  %v1536_v55 = vrot.slane %v6744_v48, 1  ;;  %v6745_v61 = vld [vmem:[%s7003_s11 + $0xa0] ss:$0 sps:$4 sm:$0x33]   ;;  %v4244_v48 = vrot.slane %v4242_v7, 2 }
  0xa6   : > { %6025 = vmatprep.mubr.msk.bf16.mxu1 %vm415_vm1, %v1517_v59  ;;  %6189 = vmatprep.mubr.msk.bf16.mxu0 %vm415_vm1, %v3708_v0  ;;  %v3725_v59 = vrot.slane %v6741_v49, 2  ;;  %v3727_v0 = vrot.slane %v6743_v54, 2  ;;  %v3729_v16 = vrot.slane %v6745_v61, 2 }
  0xa7   : > { %v1537_v1 = vsel %vm1514_vm5, %v1534_v51, %v1536_v55  ;;  %v6758_v51 = vld [vmem:[%s7003_s11 + $0x40] sm:$0xff]  }
  0xa8   : > { %v3728_v13 = vsel %vm3182_vm3, %v3725_v59, %v3727_v0  ;;  %v3730_v29 = vsel %vm3182_vm3, %v3727_v0, %v3729_v16  ;;  %v4260_v62 = vshrl.u32 %v6758_v51, 16  ;;  %v6759_v0 = vld [vmem:[%s7003_s11 + $0x90] ss:$0 sps:$4 sm:$0x11]  }
  0xad   : > { %6026 = vmatmul.mubr.msk.bf16.vlgmr.msra.gmra.mrb[0].mxu1 %vm415_vm1, %v1519_v4  ;;  %6190 = vmatmul.mubr.msk.bf16.gmra.mrb[12].mxu0 %vm415_vm1, %v3710_v11  ;;  %v4210_v4 = vshll.u32 %v6747_v56, 16  ;;  %v1540_v11 = vrot.slane %v6749_v40, 1 }
  0xae   : > { %6029 = vmatprep.mubr.msk.bf16.mxu1 %vm415_vm1, %v1521_v8  ;;  %6062 = vmatpush3.bf16.msra.mxu1 %v2118_v10  ;;  %v3726_v8 = vsel %vm3182_vm3, %v3723_v46, %v3725_v59  ;;  %v4220_v10 = vrot.slane %v4218_v63, 3  ;;  %v6760_v59 = vld [vmem:[%s7003_s11 + $0x48] sm:$0xff]   ;;  %v4263_v63 = vshll.u32 %v6758_v51, 16 }
  0xaf   : > { %6584 = vmatprep.subr.msk.bf16.mxu1 %vm470_vm0, %v6818_v22  ;;  %6193 = vmatprep.mubr.msk.bf16.mxu0 %vm415_vm1, %v3712_v14  ;;  %v4209_v14 = vrot.slane %v4207_v2, 2  ;;  %v4212_v15 = vrot.slane %v4210_v4, 3  ;;  %v4224_v22 = vshrl.u32 %v6750_v6, 16  ;;  %v4272_v2 = vshll.u32 %v6760_v59, 16  ;;  %v6761_v4 = vld [vmem:[%s7003_s11 + $0x8] sm:$0xfe]  }
  0xb0   : > { %v4221_v23 = vor.u32 %v4220_v10, %v4217_v9  ;;  %v4262_v9 = vrot.slane %v4260_v62, 2  ;;  %v4265_v10 = vrot.slane %v4263_v63, 3  ;;  %v6772_v63 = vld [vmem:[%s7003_s11 + $0x38] sm:$0xff]  }
  0xb1   : > { %v4226_v30 = vrot.slane %v4224_v22, 2  ;;  %v6765_v22 = vld [vmem:[%s7003_s11 + $0x58] sm:$0xff]  }
  0xb2   : > { %v4287_v25 = vshrl.u32 %v6765_v22, 16 }
  0xb5   : > { %6030 = vmatmul.mubr.msk.bf16.gmra.mrb[4].mxu1 %vm415_vm1, %v1523_v18  ;;  %6194 = vmatmul.mubr.msk.bf16.gmra.mrb[16].mxu0 %vm415_vm1, %v3714_v24  ;;  %v1539_v18 = vsel %vm1514_vm5, %v1536_v55, %v1538_v5  ;;  %v1541_v24 = vsel %vm1514_vm5, %v1538_v5, %v1540_v11  ;;  %v4943_v55 = vsel %vm470_vm0, %v7228_v38, 0  ;;  %v6762_v5 = vld [vmem:[%s7003_s11 + $0x10] sm:$0xff]  }
  0xb6   : > { %6033 = vmatprep.mubr.msk.bf16.mxu1 %vm415_vm1, %v1525_v21  ;;  %6197 = vmatprep.mubr.msk.bf16.mxu0 %vm415_vm1, %v3716_v27  ;;  %v4213_v21 = vor.u32 %v4212_v15, %v4209_v14  ;;  %v1542_v27 = vrot.slane %v6751_v17, 1  ;;  %v4274_v14 = vrot.slane %v4272_v2, 3  ;;  %v2026_v15 = vrot.slane %v6761_v4, 1  ;;  %v6774_v2 = vld [vmem:[%s7003_s11 + $0x40] sm:$0xff]  }
  0xb7   : > { %v2027_v16 = vrot.slane %v6762_v5, 1  ;;  %v4266_v17 = vor.u32 %v4265_v10, %v4262_v9  ;;  %v6775_v9 = vld [vmem:[%s7003_s11 + $0x80] sm:$0xff]  }
  0xb8   : > { %v1543_v42 = vsel %vm1514_vm5, %v1540_v11, %v1542_v27  ;;  %v1550_v11 = vrot.slane %v6759_v0, 1 }
  0xbd   : > { %6034 = vmatmul.mubr.msk.bf16.gmra.mrb[8].mxu1 %vm415_vm1, %v1527_v31  ;;  %6198 = vmatmul.mubr.msk.bf16.gmra.mrb[20].mxu0 %vm415_vm1, %v3718_v37  ;;  %v4229_v31 = vrot.slane %v4227_v19, 3  ;;  %v1544_v37 = vrot.slane %v6753_v26, 1  ;;  %v4278_v19 = vshrl.u32 %v6763_v12, 16  ;;  %v4290_v26 = vshll.u32 %v6765_v22, 16 }
  0xbe   : > { %6037 = vmatprep.mubr.msk.bf16.mxu1 %vm415_vm1, %v1529_v34  ;;  %6201 = vmatprep.mubr.msk.bf16.mxu0 %vm415_vm1, %v3720_v57  ;;  %v4222_v34 = vsel %vm4205_vm6, %v4213_v21, %v4221_v23  ;;  %v4245_v57 = vshll.u32 %v6754_v28, 16  ;;  %v6764_v21 = vld [vmem:[%s7003_s11 + $0x18] sm:$0xff]   ;;  %v4332_v22 = vshrl.u32 %v6775_v9, 16 }
  0xbf   : > { %v4230_v41 = vor.u32 %v4229_v31, %v4226_v30  ;;  %v1545_v46 = vsel %vm1514_vm5, %v1542_v27, %v1544_v37  ;;  %v6766_v27 = vld [vmem:[%s7003_s11 + $0x20] sm:$0xff]   ;;  %v4283_v30 = vrot.slane %v4281_v20, 3  ;;  %v2029_v31 = vrot.slane %v6764_v21, 1 }
  0xc0   : > { %v4247_v49 = vrot.slane %v4245_v57, 3  ;;  %v4292_v35 = vrot.slane %v4290_v26, 3  ;;  %v4334_v26 = vrot.slane %v4332_v22, 2 }
  0xc1   : > { %v4231_v52 = vsel %vm4205_vm6, %v4221_v23, %v4230_v41  ;;  %v4240_v56 = vsel %vm4205_vm6, %v4230_v41, %v4239_v45  ;;  %v2030_v57 = vsel %vm1514_vm5, %v2027_v16, %v2029_v31  ;;  %v4296_v41 = vshrl.u32 %v6767_v32, 16 }
  0xc2   : > { %v4248_v40 = vor.u32 %v4247_v49, %v4244_v48  ;;  %v6770_v48 = vld [vmem:[%s7003_s11 + $0x30] sm:$0xff]  }
  0xc4   : > { %v4249_v6 = vsel %vm4205_vm6, %v4239_v45, %v4248_v40 }
  0xc5   : > { %6038 = vmatmul.mubr.msk.bf16.gmra.mrb[12].mxu1 %vm415_vm1, %v1531_v44  ;;  %6202 = vmatmul.mubr.msk.bf16.gmra.mrb[24].mxu0 %vm415_vm1, %v3722_v50  ;;  %v4254_v44 = vshll.u32 %v6756_v33, 16  ;;  %v1546_v50 = vrot.slane %v6755_v39, 1  ;;  %v6769_v39 = vld [vmem:[%s7003_s11 + $0x68] sm:$0xff]  }
  0xc6   : > { %6041 = vmatprep.mubr.msk.bf16.mxu1 %vm415_vm1, %v1533_v47  ;;  %6205 = vmatprep.mubr.msk.bf16.mxu0 %vm415_vm1, %v3724_v53  ;;  %v6757_v47 = vld [vmem:[%s7003_s11 + $0x88] sm:$0xff]   ;;  %v4253_v53 = vrot.slane %v4251_v43, 2 }
  0xc7   : > { %v4256_v54 = vrot.slane %v4254_v44, 3  ;;  %v1548_v58 = vrot.slane %v6757_v47, 1  ;;  %v6768_v43 = vld [vmem:[%s7003_s11 + $0x28] sm:$0xff]   ;;  %v4308_v47 = vshll.u32 %v6769_v39, 16 }
  0xc9   : > { %v4257_v61 = vor.u32 %v4256_v54, %v4253_v53  ;;  %v1549_v38 = vsel %vm1514_vm5, %v1546_v50, %v1548_v58  ;;  %v6771_v53 = vld [vmem:[%s7003_s11 + $0x70] sm:$0xff]  }
  0xca   : > { %v4317_v62 = vshll.u32 %v6771_v53, 16 }
  0xcb   : > { %v4267_v28 = vsel %vm4205_vm6, %v4257_v61, %v4266_v17 }
  0xcd   : > { %6042 = vmatmul.mubr.msk.bf16.gmra.mrb[16].mxu1 %vm415_vm1, %v1535_v60  ;;  %6206 = vmatmul.mubr.msk.bf16.gmra.mrb[28].mxu0 %vm415_vm1, %v3726_v8  ;;  %v1547_v60 = vsel %vm1514_vm5, %v1544_v37, %v1546_v50  ;;  %v4258_v8 = vsel %vm4205_vm6, %v4248_v40, %v4257_v61  ;;  %v2031_v37 = vrot.slane %v6766_v27, 1  ;;  %v4298_v50 = vrot.slane %v4296_v41, 2 }
  0xce   : > { %6045 = vmatprep.mubr.msk.bf16.mxu1 %vm415_vm1, %v1537_v1  ;;  %6209 = vmatprep.mubr.msk.bf16.mxu0 %vm415_vm1, %v3728_v13  ;;  %v4269_v1 = vshrl.u32 %v6760_v59, 16  ;;  %v6773_v59 = vld [vmem:[%s7003_s11 + $0x78] sm:$0xff]   ;;  %v4314_v61 = vshrl.u32 %v6771_v53, 16 }
  0xcf   : > { %v2032_v45 = vsel %vm1514_vm5, %v2029_v31, %v2031_v37 }
  0xd0   : > { %v4271_v13 = vrot.slane %v4269_v1, 2  ;;  %v4326_v1 = vshll.u32 %v6773_v59, 16  ;;  %v4316_v5 = vrot.slane %v4314_v61, 2 }
  0xd2   : > { %v4275_v23 = vor.u32 %v4274_v14, %v4271_v13  ;;  %v4328_v12 = vrot.slane %v4326_v1, 3  ;;  %v2039_v13 = vrot.slane %v6774_v2, 1  ;;  %v6777_v14 = vld [vmem:[%s7003_s11 + $0x88] sm:$0xff]   ;;  %v6785_v2 = vld [vmem:[%s7003_s11 + $0x10] sm:$0xf8]  }
  0xd3   : > { %v4341_v21 = vshrl.u32 %v6777_v14, 16 }
  0xd4   : > { %v4276_v33 = vsel %vm4205_vm6, %v4266_v17, %v4275_v23  ;;  %v4335_v17 = vshll.u32 %v6775_v9, 16  ;;  %v6789_v9 = vld [vmem:[%s7003_s11 + $0x78] sm:$0xff]  }
  0xd5   : > { %6046 = vmatmul.mubr.msk.bf16.gmra.mrb[20].mxu1 %vm415_vm1, %v1539_v18  ;;  %6210 = vmatmul.mubr.msk.bf16.gmra.mrb[32].mxu0 %vm415_vm1, %v3730_v29  ;;  %v1551_v18 = vsel %vm1514_vm5, %v1548_v58, %v1550_v11  ;;  %v4280_v29 = vrot.slane %v4278_v19, 2  ;;  %v2035_v58 = vrot.slane %v6770_v48, 1  ;;  %v4343_v31 = vrot.slane %v4341_v21, 2  ;;  %v6793_v21 = vld [vmem:[%s7003_s11 + $0x88] sm:$0xff]  }
  0xd6   : > { %6049 = vmatprep.mubr.msk.bf16.mxu1 %vm415_vm1, %v1541_v24  ;;  %6215 = vmatprep.mubr.msk.bf16.mxu0 %vm415_vm1, %v4222_v34  ;;  %v2028_v24 = vsel %vm1514_vm5, %v2026_v15, %v2027_v16  ;;  %v4289_v34 = vrot.slane %v4287_v25, 2  ;;  %v4337_v27 = vrot.slane %v4335_v17, 3  ;;  %v6790_v17 = vld [vmem:[%s7003_s11 + $0x28] sm:$0xff]  }
  0xd7   : > { %v4284_v7 = vor.u32 %v4283_v30, %v4280_v29  ;;  %v6779_v29 = vld [vmem:[%s7003_s11 + $0x90] sm:$0xff]  }
  0xd8   : > { %v4293_v44 = vor.u32 %v4292_v35, %v4289_v34  ;;  %v6781_v34 = vld [vmem:[%s7003_s11 + $0x98] sm:$0xff]   ;;  %v4338_v35 = vor.u32 %v4337_v27, %v4334_v26  ;;  %v6799_v26 = vld [vmem:[%s7003_s11 + $0x60] sm:$0xff]  }
  0xd9   : > { %v4285_v49 = vsel %vm4205_vm6, %v4275_v23, %v4284_v7  ;;  %v4344_v23 = vshll.u32 %v6777_v14, 16 }
  0xda   : > { %v4294_v54 = vsel %vm4205_vm6, %v4284_v7, %v4293_v44  ;;  %v4353_v7 = vshll.u32 %v6779_v29, 16 }
  0xdc   : > { %v4355_v48 = vrot.slane %v4353_v7, 3  ;;  %v6801_v7 = vld [vmem:[%s7003_s11 + $0x68] sm:$0xff]  }
  0xdd   : > { %6050 = vmatmul.mubr.msk.bf16.gmra.mrb[24].mxu1 %vm415_vm1, %v1543_v42  ;;  %6216 = vmatmul.mubr.msk.bf16.vlgmr.msra.gmra.mrb[0].mxu0 %vm415_vm1, %v4231_v52  ;;  %v4299_v42 = vshll.u32 %v6767_v32, 16  ;;  %v2033_v52 = vrot.slane %v6768_v43, 1  ;;  %v4346_v32 = vrot.slane %v4344_v23, 3  ;;  %v4359_v43 = vshrl.u32 %v6781_v34, 16 }
  0xde   : > { %6053 = vmatprep.mubr.msk.bf16.mxu1 %vm415_vm1, %v1545_v46  ;;  %6252 = vmatpush3.bf16.msra.mxu0 %v4943_v55  ;;  %v4305_v46 = vshrl.u32 %v6769_v39, 16  ;;  %v4350_v39 = vshrl.u32 %v6779_v29, 16  ;;  %v4856_v23 = vrot.slane %v6790_v17, 3  ;;  %v2057_v29 = vrot.slane %v6793_v21, 1 }
  0xdf   : > { %6219 = vmatprep.mubr.msk.bf16.mxu0 %vm415_vm1, %v4240_v56  ;;  %v4301_v51 = vrot.slane %v4299_v42, 3  ;;  %v4310_v56 = vrot.slane %v4308_v47, 3  ;;  %v2036_v0 = vsel %vm1514_vm5, %v2033_v52, %v2035_v58  ;;  %v4347_v41 = vor.u32 %v4346_v32, %v4343_v31  ;;  %v6794_v31 = vld [vmem:[%s7003_s11 + $0x38] sm:$0xff]  }
  0xe0   : > { %v4307_v55 = vrot.slane %v4305_v46, 2  ;;  %v4352_v47 = vrot.slane %v4350_v39, 2  ;;  %v6797_v39 = vld [vmem:[%s7003_s11 + $0x98] ss:$0 sps:$4 sm:$0x11]  }
  0xe1   : > { %v4302_v40 = vor.u32 %v4301_v51, %v4298_v50  ;;  %v6783_v50 = vld [vmem:[%s7003_s11 + $0xa0] ss:$0 sps:$4 sm:$0x77]   ;;  %v4348_v51 = vsel %vm4205_vm6, %v4338_v35, %v4347_v41 }
  0xe3   : > { %v4303_v4 = vsel %vm4205_vm6, %v4293_v44, %v4302_v40  ;;  %v4362_v44 = vshll.u32 %v6781_v34, 16  ;;  %v2640_v34 = vshll.u32 %v6799_v26, 16 }
  0xe5   : > { %6054 = vmatmul.mubr.msk.bf16.gmra.mrb[28].mxu1 %vm415_vm1, %v1547_v60  ;;  %6220 = vmatmul.mubr.msk.bf16.gmra.mrb[4].mxu0 %vm415_vm1, %v4249_v6  ;;  %v2034_v60 = vsel %vm1514_vm5, %v2031_v37, %v2033_v52  ;;  %v4319_v6 = vrot.slane %v4317_v62, 3  ;;  %v4361_v52 = vrot.slane %v4359_v43, 2  ;;  %v4364_v53 = vrot.slane %v4362_v44, 3  ;;  %v6787_v62 = vld [vmem:[%s7003_s11 + $0x70] sm:$0xff]  }
  0xe6   : > { %6057 = vmatprep.mubr.msk.bf16.mxu1 %vm415_vm1, %v1549_v38  ;;  %6223 = vmatprep.mubr.msk.bf16.mxu0 %vm415_vm1, %v4258_v8  ;;  %v4323_v38 = vshrl.u32 %v6773_v59, 16  ;;  %v2037_v8 = vrot.slane %v6772_v63, 1  ;;  %v4371_v59 = vshll.u32 %v6783_v50, 16  ;;  %v2642_v43 = vrot.slane %v2640_v34, 2  ;;  %v6803_v44 = vld [vmem:[%s7003_s11 + $0x70] sm:$0xff]  }
  0xe7   : > { %v4320_v15 = vor.u32 %v4319_v6, %v4316_v5  ;;  %v2051_v5 = vrot.slane %v6787_v62, 1  ;;  %v6813_v34 = vld [vmem:[%s7003_s11 + $0x98] ss:$0 sps:$4 sm:$0x33]  }
  0xe8   : > { %v4325_v11 = vrot.slane %v4323_v38, 2  ;;  %v2038_v16 = vsel %vm1514_vm5, %v2035_v58, %v2037_v8  ;;  %v2040_v20 = vsel %vm1514_vm5, %v2037_v8, %v2039_v13  ;;  %v4368_v58 = vshrl.u32 %v6783_v50, 16 }
  0xea   : > { %v4329_v19 = vor.u32 %v4328_v12, %v4325_v11 }
  0xec   : > { %v4330_v30 = vsel %vm4205_vm6, %v4320_v15, %v4329_v19  ;;  %v4339_v46 = vsel %vm4205_vm6, %v4329_v19, %v4338_v35 }
  0xed   : > { %6058 = vmatmul.mubr.msk.bf16.gmra.mrb[32].mxu1 %vm415_vm1, %v1551_v18  ;;  %6224 = vmatmul.mubr.msk.bf16.gmra.mrb[8].mxu0 %vm415_vm1, %v4267_v28  ;;  %v6776_v18 = vld [vmem:[%s7003_s11 + $0x48] sm:$0xff]  }
  0xee   : > { %6063 = vmatprep.mubr.msk.bf16.mxu1 %vm415_vm1, %v2028_v24  ;;  %6227 = vmatprep.mubr.msk.bf16.mxu0 %vm415_vm1, %v4276_v33  ;;  %v6778_v24 = vld [vmem:[%s7003_s11 + $0x50] sm:$0xff]   ;;  %v2041_v28 = vrot.slane %v6776_v18, 1 }
  0xef   : > { %v2043_v33 = vrot.slane %v6778_v24, 1 }
  0xf0   : > { %v2042_v37 = vsel %vm1514_vm5, %v2039_v13, %v2041_v28  ;;  %v6791_v13 = vld [vmem:[%s7003_s11 + $0x80] sm:$0xff]  }
  0xf1   : > { %v2044_v42 = vsel %vm1514_vm5, %v2041_v28, %v2043_v33  ;;  %v2055_v18 = vrot.slane %v6791_v13, 1  ;;  %v6792_v28 = vld [vmem:[%s7003_s11 + $0x30] sm:$0xff]  }
  0xf2   : > { %v4858_v35 = vrot.slane %v6792_v28, 3 }
  0xf5   : > { %6064 = vmatmul.mubr.msk.bf16.vlgmr.msra.gmra.mrb[0].mxu1 %vm415_vm1, %v2030_v57  ;;  %6228 = vmatmul.mubr.msk.bf16.gmra.mrb[12].mxu0 %vm415_vm1, %v4285_v49  ;;  %v6780_v57 = vld [vmem:[%s7003_s11 + $0x58] sm:$0xff]  }
  0xf6   : > { %6067 = vmatprep.mubr.msk.bf16.mxu1 %vm415_vm1, %v2032_v45  ;;  %6290 = vmatpush3.bf16.msra.mxu1 %v6989_v3  ;;  %v4311_v3 = vor.u32 %v4310_v56, %v4307_v55  ;;  %v6782_v45 = vld [vmem:[%s7003_s11 + $0x60] sm:$0xff]   ;;  %v2045_v49 = vrot.slane %v6780_v57, 1  ;;  %v4356_v55 = vor.u32 %v4355_v48, %v4352_v47  ;;  %v4860_v57 = vrot.slane %v6794_v31, 3 }
  0xf7   : > { %6231 = vmatprep.mubr.msk.bf16.mxu0 %vm415_vm1, %v4294_v54  ;;  %v2047_v54 = vrot.slane %v6782_v45, 1  ;;  %v4859_v45 = vsel %vm4850_vm7, %v4856_v23, %v4858_v35  ;;  %v2061_v47 = vrot.slane %v6797_v39, 1  ;;  %v2646_v48 = vshrl.u32 %v6801_v7, 16 }
  0xf8   : > { %v4312_v10 = vsel %vm4205_vm6, %v4302_v40, %v4311_v3  ;;  %v4321_v25 = vsel %vm4205_vm6, %v4311_v3, %v4320_v15  ;;  %v2046_v56 = vsel %vm1514_vm5, %v2043_v33, %v2045_v49  ;;  %v6784_v40 = vld [vmem:[%s7003_s11 + $0x68] sm:$0xff]   ;;  %v4357_v63 = vsel %vm4205_vm6, %v4347_v41, %v4356_v55  ;;  %v6788_v15 = vld [vmem:[%s7003_s11 + $0x20] sm:$0xff]  }
  0xf9   : > { %v2048_v61 = vsel %vm1514_vm5, %v2045_v49, %v2047_v54  ;;  %v4370_v3 = vrot.slane %v4368_v58, 2  ;;  %v2049_v38 = vrot.slane %v6784_v40, 1  ;;  %v4854_v19 = vrot.slane %v6788_v15, 3  ;;  %v6805_v40 = vld [vmem:[%s7003_s11 + $0x78] sm:$0xff]  }
  0xfa   : > { %v2637_v33 = vshrl.u32 %v6799_v26, 16  ;;  %v2649_v49 = vshll.u32 %v6801_v7, 16  ;;  %v4861_v50 = vsel %vm4850_vm7, %v4858_v35, %v4860_v57  ;;  %v2648_v58 = vrot.slane %v2646_v48, 1  ;;  %v6806_v26 = vld [vmem:[%s7003_s11 + $0x68] sm:$0xff]  }
  0xfb   : > { %v2050_v8 = vsel %vm1514_vm5, %v2047_v54, %v2049_v38  ;;  %v2052_v12 = vsel %vm1514_vm5, %v2049_v38, %v2051_v5  ;;  %v2658_v54 = vshll.u32 %v6803_v44, 16  ;;  %v6800_v38 = vld [vmem:[%s7003_s11 + $0x50] sm:$0xff]   ;;  %v4872_v35 = vrot.slane %v6806_v26, 3 }
  0xfd   : > { %6068 = vmatmul.mubr.msk.bf16.gmra.mrb[4].mxu1 %vm415_vm1, %v2034_v60  ;;  %6232 = vmatmul.mubr.msk.bf16.gmra.mrb[16].mxu0 %vm415_vm1, %v4303_v4  ;;  %v4365_v60 = vor.u32 %v4364_v53, %v4361_v52  ;;  %v6786_v4 = vld [vmem:[%s7003_s11 + $0x18] sm:$0xff]   ;;  %v2655_v53 = vshrl.u32 %v6803_v44, 16  ;;  %v2703_v44 = vshll.u32 %v6813_v34, 16 }
  0xfe   : > { %6071 = vmatprep.mubr.msk.bf16.mxu1 %vm415_vm1, %v2036_v0  ;;  %6235 = vmatprep.mubr.msk.bf16.mxu0 %vm415_vm1, %v4312_v10  ;;  %v4373_v0 = vrot.slane %v4371_v59, 3  ;;  %v4851_v10 = vrot.slane %v6785_v2, 3  ;;  %v4852_v11 = vrot.slane %v6786_v4, 3  ;;  %v2651_v59 = vrot.slane %v2649_v49, 2 }
  0xff   : > { %v4366_v1 = vsel %vm4205_vm6, %v4356_v55, %v4365_v60  ;;  %v2657_v62 = vrot.slane %v2655_v53, 1  ;;  %v2664_v2 = vshrl.u32 %v6805_v40, 16  ;;  %v2667_v4 = vshll.u32 %v6805_v40, 16 }
 0x100   : > { %v4374_v6 = vor.u32 %v4373_v0, %v4370_v3  ;;  %v4853_v22 = vsel %vm4850_vm7, %v4851_v10, %v4852_v11  ;;  %v4855_v27 = vsel %vm4850_vm7, %v4852_v11, %v4854_v19  ;;  %v6807_v3 = vld [vmem:[%s7003_s11 + $0x80] sm:$0xff]   ;;  %v4866_v10 = vrot.slane %v6800_v38, 3 }
 0x101   : > { %v2669_v13 = vrot.slane %v2667_v4, 2  ;;  %v6817_v4 = vld [vmem:[%s7003_s11 + $0xa0] ss:$0 sps:$4 sm:$0x77]  }
 0x102   : > { %v4375_v14 = vsel %vm4205_vm6, %v4365_v60, %v4374_v6  ;;  %v6802_v6 = vld [vmem:[%s7003_s11 + $0x58] sm:$0xff]  }
 0x103   : > { %v4868_v15 = vrot.slane %v6802_v6, 3  ;;  %v4886_v6 = vrot.slane %v6817_v4, 3 }
 0x105   : > { %6072 = vmatmul.mubr.msk.bf16.gmra.mrb[8].mxu1 %vm415_vm1, %v2038_v16  ;;  %6236 = vmatmul.mubr.msk.bf16.gmra.mrb[20].mxu0 %vm415_vm1, %v4321_v25  ;;  %v2053_v16 = vrot.slane %v6789_v9, 1  ;;  %v6795_v25 = vld [vmem:[%s7003_s11 + $0x90] sm:$0xff]   ;;  %v2676_v9 = vshll.u32 %v6807_v3, 16 }
 0x106   : > { %6075 = vmatprep.mubr.msk.bf16.mxu1 %vm415_vm1, %v2040_v20  ;;  %6239 = vmatprep.mubr.msk.bf16.mxu0 %vm415_vm1, %v4330_v30  ;;  %v4857_v30 = vsel %vm4850_vm7, %v4854_v19, %v4856_v23  ;;  %v2059_v32 = vrot.slane %v6795_v25, 1  ;;  %v4869_v25 = vsel %vm4850_vm7, %v4866_v10, %v4868_v15 }
 0x107   : > { %v2054_v20 = vsel %vm1514_vm5, %v2051_v5, %v2053_v16  ;;  %v2056_v24 = vsel %vm1514_vm5, %v2053_v16, %v2055_v18  ;;  %v2678_v17 = vrot.slane %v2676_v9, 2 }
 0x108   : > { %v2060_v41 = vsel %vm1514_vm5, %v2057_v29, %v2059_v32 }
 0x10d   : > { %6076 = vmatmul.mubr.msk.bf16.gmra.mrb[12].mxu1 %vm415_vm1, %v2042_v37  ;;  %6240 = vmatmul.mubr.msk.bf16.gmra.mrb[24].mxu0 %vm415_vm1, %v4339_v46  ;;  %v2058_v37 = vsel %vm1514_vm5, %v2055_v18, %v2057_v29  ;;  %v6796_v46 = vld [vmem:[%s7003_s11 + $0x40] sm:$0xff]   ;;  %v6811_v18 = vld [vmem:[%s7003_s11 + $0x90] sm:$0xff]  }
 0x10e   : > { %6079 = vmatprep.mubr.msk.bf16.mxu1 %vm415_vm1, %v2044_v42  ;;  %6243 = vmatprep.mubr.msk.bf16.mxu0 %vm415_vm1, %v4348_v51  ;;  %v2639_v42 = vrot.slane %v2637_v33, 1  ;;  %v6798_v51 = vld [vmem:[%s7003_s11 + $0x48] sm:$0xff]   ;;  %v4862_v55 = vrot.slane %v6796_v46, 3  ;;  %v2691_v28 = vshrl.u32 %v6811_v18, 16  ;;  %v2694_v29 = vshll.u32 %v6811_v18, 16  ;;  %v6810_v46 = vld [vmem:[%s7003_s11 + $0x78] sm:$0xff]  }
 0x10f   : > { %v4864_v60 = vrot.slane %v6798_v51, 3  ;;  %v2705_v51 = vrot.slane %v2703_v44, 2 }
 0x110   : > { %v2643_v52 = vor.u32 %v2642_v43, %v2639_v42  ;;  %v4863_v0 = vsel %vm4850_vm7, %v4860_v57, %v4862_v55  ;;  %v2693_v39 = vrot.slane %v2691_v28, 1  ;;  %v2696_v7 = vrot.slane %v2694_v29, 2  ;;  %v7559_v29 = vld [vmem:[%s7702_s2] ss:$0 sm:$0xff] }
 0x111   : > { %v4865_v5 = vsel %vm4850_vm7, %v4862_v55, %v4864_v60  ;;  %v4867_v19 = vsel %vm4850_vm7, %v4864_v60, %v4866_v10  ;;  %v2700_v43 = vshrl.u32 %v6813_v34, 16  ;;  %v6812_v55 = vld [vmem:[%s7003_s11 + $0x80] sm:$0xff]  }
 0x112   : > { %v4878_v40 = vrot.slane %v6812_v55, 3 }
 0x115   : > { %6080 = vmatmul.mubr.msk.bf16.gmra.mrb[16].mxu1 %vm415_vm1, %v2046_v56  ;;  %6244 = vmatmul.mubr.msk.bf16.gmra.mrb[28].mxu0 %vm415_vm1, %v4357_v63  ;;  %v2062_v56 = vsel %vm1514_vm5, %v2059_v32, %v2061_v47  ;;  %v2660_v63 = vrot.slane %v2658_v54, 2  ;;  %v2697_v47 = vor.u32 %v2696_v7, %v2693_v39 }
 0x116   : > { %6083 = vmatprep.mubr.msk.bf16.mxu1 %vm415_vm1, %v2048_v61  ;;  %6247 = vmatprep.mubr.msk.bf16.mxu0 %vm415_vm1, %v4366_v1  ;;  %v2644_v61 = vsel %vm2537_vm2, %v7075_v36, %v2643_v52  ;;  %v2652_v1 = vor.u32 %v2651_v59, %v2648_v58  ;;  %v2673_v36 = vshrl.u32 %v6807_v3, 16  ;;  %v6814_v59 = vld [vmem:[%s7003_s11 + $0x88] sm:$0xff]  }
 0x118   : > { %v2653_v11 = vsel %vm2537_vm2, %v2643_v52, %v2652_v1  ;;  %v4876_v52 = vrot.slane %v6810_v46, 3 }
 0x11d   : > { %6084 = vmatmul.mubr.msk.bf16.gmra.mrb[20].mxu1 %vm415_vm1, %v2050_v8  ;;  %6248 = vmatmul.mubr.msk.bf16.gmra.mrb[32].mxu0 %vm415_vm1, %v4375_v14  ;;  %v2661_v8 = vor.u32 %v2660_v63, %v2657_v62  ;;  %v6809_v14 = vld [vmem:[%s7003_s11 + $0x88] sm:$0xff]   ;;  %v4879_v62 = vsel %vm4850_vm7, %v4876_v52, %v4878_v40  ;;  %v6815_v63 = vld [vmem:[%s7003_s11 + $0x90] sm:$0xff]  }
 0x11e   : > { %6087 = vmatprep.mubr.msk.bf16.mxu1 %vm415_vm1, %v2052_v12  ;;  %6253 = vmatprep.mubr.msk.bf16.mxu0 %vm415_vm1, %v4853_v22  ;;  %v2666_v12 = vrot.slane %v2664_v2, 1  ;;  %v2675_v22 = vrot.slane %v2673_v36, 1  ;;  %v2682_v23 = vshrl.u32 %v6809_v14, 16  ;;  %v4882_v38 = vrot.slane %v6815_v63, 3 }
 0x11f   : > { %v2662_v16 = vsel %vm2537_vm2, %v2652_v1, %v2661_v8 }
 0x120   : > { %v2670_v21 = vor.u32 %v2669_v13, %v2666_v12  ;;  %v2684_v32 = vrot.slane %v2682_v23, 1 }
 0x122   : > { %v2671_v31 = vsel %vm2537_vm2, %v2661_v8, %v2670_v21 }
 0x125   : > { %6088 = vmatmul.mubr.msk.bf16.gmra.mrb[24].mxu1 %vm415_vm1, %v2054_v20  ;;  %6254 = vmatmul.mubr.msk.bf16.vlgmr.msra.gmra.mrb[0].mxu0 %vm415_vm1, %v4855_v27  ;;  %v6804_v20 = vld [vmem:[%s7003_s11 + $0x60] sm:$0xff]   ;;  %v2679_v27 = vor.u32 %v2678_v17, %v2675_v22 }
 0x126   : > { %6091 = vmatprep.mubr.msk.bf16.mxu1 %vm415_vm1, %v2056_v24  ;;  %6257 = vmatprep.mubr.msk.bf16.mxu0 %vm415_vm1, %v4857_v30  ;;  %v2685_v24 = vshll.u32 %v6809_v14, 16  ;;  %v4870_v30 = vrot.slane %v6804_v20, 3 }
 0x128   : > { %v2687_v33 = vrot.slane %v2685_v24, 2  ;;  %v4871_v57 = vsel %vm4850_vm7, %v4868_v15, %v4870_v30 }
 0x12a   : > { %v2688_v42 = vor.u32 %v2687_v33, %v2684_v32 }
 0x12c   : > { %v2689_v49 = vsel %vm2537_vm2, %v2679_v27, %v2688_v42  ;;  %v2698_v53 = vsel %vm2537_vm2, %v2688_v42, %v2697_v47 }
 0x12d   : > { %6092 = vmatmul.mubr.msk.bf16.gmra.mrb[28].mxu1 %vm415_vm1, %v2058_v37  ;;  %6258 = vmatmul.mubr.msk.bf16.gmra.mrb[4].mxu0 %vm415_vm1, %v4859_v45  ;;  %v2680_v37 = vsel %vm2537_vm2, %v2670_v21, %v2679_v27  ;;  %v4873_v45 = vsel %vm4850_vm7, %v4870_v30, %v4872_v35 }
 0x12e   : > { %6095 = vmatprep.mubr.msk.bf16.mxu1 %vm415_vm1, %v2060_v41  ;;  %6261 = vmatprep.mubr.msk.bf16.mxu0 %vm415_vm1, %v4861_v50  ;;  %v6808_v41 = vld [vmem:[%s7003_s11 + $0x70] sm:$0xff]   ;;  %v2702_v50 = vrot.slane %v2700_v43, 1 }
 0x12f   : > { %v4874_v48 = vrot.slane %v6808_v41, 3 }
 0x131   : > { %v4875_v54 = vsel %vm4850_vm7, %v4872_v35, %v4874_v48  ;;  %v4877_v58 = vsel %vm4850_vm7, %v4874_v48, %v4876_v52 }
 0x135   : > { %6096 = vmatmul.mubr.msk.bf16.gmra.mrb[32].mxu1 %vm415_vm1, %v2062_v56  ;;  %6262 = vmatmul.mubr.msk.bf16.gmra.mrb[8].mxu0 %vm415_vm1, %v4863_v0  ;;  %v2706_v56 = vor.u32 %v2705_v51, %v2702_v50  ;;  %v6816_v0 = vld [vmem:[%s7003_s11 + $0x98] sm:$0xff]   ;;  %s7563_s11 = scalar_lea.vmem [#allocation3], %s6589_s8 }
 0x136   : > { %6121 = vmatprep.mubr.msk.bf16.mxu1 %vm415_vm1, %v2644_v61  ;;  %6265 = vmatprep.mubr.msk.bf16.mxu0 %vm415_vm1, %v4865_v5  ;;  %v4880_v61 = vrot.slane %v6814_v59, 3  ;;  %v4884_v1 = vrot.slane %v6816_v0, 3  ;;  %s5324_s19 = sshll.u32 %s7563_s11, 4  ;;  %s7646_s19 = int_to_ptr.vmem [resolvable:$true] %s5324_s19 }
 0x137   : > { %v2707_v60 = vsel %vm2537_vm2, %v2697_v47, %v2706_v56  ;;  %s6819_s27 = scalar_lea.vmem %s7646_s19, 4608  ;;  %p6826_p1 = scmp.lt.s32.totalorder %s7646_s19, %s6824_s29 }
 0x138   : > { %v4881_v3 = vsel %vm4850_vm7, %v4878_v40, %v4880_v61  ;;  %v4883_v2 = vsel %vm4850_vm7, %v4880_v61, %v4882_v38  ;;  %v4885_v5 = vsel %vm4850_vm7, %v4882_v38, %v4884_v1  ;;  %v4887_v8 = vsel %vm4850_vm7, %v4884_v1, %v4886_v6  ;;  %p6820_p12 = scmp.ne.s32.totalorder %s7646_s19, %s6819_s27  ;;  %p6827_p2 = scmp.lt.s32.totalorder %s6825_s30, %s6819_s27 }
 0x13a   : > { %p6821_p13 = pnand %p6820_p12, %p6962_p4  ;;  %p6828_p3 = por %p6827_p2, %p6826_p1 }
 0x13c   : > { %p6822_p0 = pneg %p6821_p13 }
 0x13d   : > { %6122 = vmatmul.mubr.msk.bf16.vlgmr.msra.gmra.mrb[20].mxu1 %vm415_vm1, %v2653_v11  ;;  %6266 = vmatmul.mubr.msk.bf16.gmra.mrb[12].mxu0 %vm415_vm1, %v4867_v19 }
 0x13e   : > { %6125 = vmatprep.mubr.msk.bf16.mxu1 %vm415_vm1, %v2662_v16  ;;  %6269 = vmatprep.mubr.msk.bf16.mxu0 %vm415_vm1, %v4869_v25  ;;  %p6829_p5 = pnand %p6828_p3, %p6822_p0 }
 0x145   : > { %6126 = vmatmul.mubr.msk.bf16.gmra.mrb[24].mxu1 %vm415_vm1, %v2671_v31  ;;  %6270 = vmatmul.mubr.msk.bf16.gmra.mrb[16].mxu0 %vm415_vm1, %v4871_v57 }
 0x146   : > { %6129 = vmatprep.mubr.msk.bf16.mxu1 %vm415_vm1, %v2680_v37  ;;  %6273 = vmatprep.mubr.msk.bf16.mxu0 %vm415_vm1, %v4873_v45 }
 0x14d   : > { %6130 = vmatmul.mubr.msk.bf16.gmra.mrb[28].mxu1 %vm415_vm1, %v2689_v49  ;;  %6274 = vmatmul.mubr.msk.bf16.gmra.mrb[20].mxu0 %vm415_vm1, %v4875_v54 }
 0x14e   : > { %6133 = vmatprep.mubr.msk.bf16.mxu1 %vm415_vm1, %v2698_v53  ;;  %6277 = vmatprep.mubr.msk.bf16.mxu0 %vm415_vm1, %v4877_v58 }
 0x155   : > { %6134 = vmatmul.mubr.msk.bf16.gmra.mrb[32].mxu1 %vm415_vm1, %v2707_v60  ;;  %6278 = vmatmul.mubr.msk.bf16.gmra.mrb[24].mxu0 %vm415_vm1, %v4879_v62 }
 0x156   : > { %6281 = vmatprep.mubr.msk.bf16.mxu0 %vm415_vm1, %v4881_v3 }
 0x15d   : > { %6282 = vmatmul.mubr.msk.bf16.gmra.mrb[28].mxu0 %vm415_vm1, %v4883_v2 }
 0x15e   : > { %6285 = vmatprep.mubr.msk.bf16.mxu0 %vm415_vm1, %v4885_v5 }
 0x165   : > { %6286 = vmatmul.mubr.msk.bf16.gmra.mrb[32].mxu0 %vm415_vm1, %v4887_v8 }
 0x1c8   : > { %v6065_v36 = vpop.f32.mrb[0].mxu1 }
 0x1c9   : > { %v2154_v9 = vpop.f32.mrb[1].mxu1 }
 0x1ca   : > { %v6066_v10 = vpop.f32.mrb[2].mxu1 }
 0x1cb   : > { %v2157_v11 = vpop.f32.mrb[3].mxu1 }
 0x1d0   : > { %v6069_v12 = vpop.f32.mrb[4].mxu1 }
 0x1d1   : > { %v2170_v13 = vpop.f32.mrb[5].mxu1 }
 0x1d2   : > { %v6070_v14 = vpop.f32.mrb[6].mxu1 }
 0x1d3   : > { %v2173_v15 = vpop.f32.mrb[7].mxu1 }
 0x1d8   : > { %v6073_v16 = vpop.f32.mrb[8].mxu1 }
 0x1d9   : > { %v2186_v22 = vpop.f32.mrb[9].mxu1 }
 0x1da   : > { %v6074_v17 = vpop.f32.mrb[10].mxu1 }
 0x1db   : > { %v2189_v18 = vpop.f32.mrb[11].mxu1 }
 0x1e0   : > { %v7537_v19 = vpop.f32.mrb[12].mxu1 }
 0x1e1   : > { %v7539_v20 = vpop.f32.mrb[13].mxu1 }
 0x1e2   : > { %v7541_v21 = vpop.f32.mrb[14].mxu1 }
 0x1e3   : > { %v7543_v23 = vpop.f32.mrb[15].mxu1 }
 0x1e8   : > { %v7545_v24 = vpop.f32.mrb[16].mxu1 }
 0x1e9   : > { %v7547_v25 = vpop.f32.mrb[17].mxu1 }
 0x1ea   : > { %v7549_v26 = vpop.f32.mrb[18].mxu1 }
 0x1eb   : > { %v7551_v27 = vpop.f32.mrb[19].mxu1 }
 0x1f8   : > { %v6255_v28 = vpop.f32.mrb[0].mxu0 }
 0x1f9   : > { %v6291_v30 = vadd.f32 %v6255_v28, %v6065_v36  ;;  %v4979_v31 = vpop.f32.mrb[1].mxu0 }
 0x1fa   : > { %v6292_v32 = vadd.f32 %v4979_v31, %v2154_v9  ;;  %v6256_v33 = vpop.f32.mrb[2].mxu0 }
 0x1fb   : > { %v5239_v34 = vadd.f32 %v6291_v30, %v7559_v29  ;;  %v6293_v35 = vadd.f32 %v6256_v33, %v6066_v10  ;;  %v4982_v37 = vpop.f32.mrb[3].mxu0 }
 0x1fc   : > { %v5237_v39 = vadd.f32 %v6292_v32, %v7559_v29  ;;  %v6294_v7 = vadd.f32 %v4982_v37, %v2157_v11 }
 0x1fd   : > { %5275 = vst [vmem:[%s7563_s11 + $0x10] sm:$0xff] %v5239_v34  ;;  %v5240_v57 = vadd.f32 %v6293_v35, %v7559_v29 }
 0x1fe   : > { %5273 = vst [vmem:[%s7563_s11] sm:$0xff] %v5237_v39  ;;  %v5238_v41 = vadd.f32 %v6294_v7, %v7559_v29 }
 0x1ff   : > { %5276 = vst [vmem:[%s7563_s11 + $0x18] sm:$0xff] %v5240_v57 }
 0x200   : > { %5274 = vst [vmem:[%s7563_s11 + $0x8] sm:$0xff] %v5238_v41  ;;  %v6259_v42 = vpop.f32.mrb[4].mxu0 }
 0x201   : > { %v6295_v43 = vadd.f32 %v6259_v42, %v6069_v12  ;;  %v4995_v44 = vpop.f32.mrb[5].mxu0 }
 0x202   : > { %v6296_v45 = vadd.f32 %v4995_v44, %v2170_v13  ;;  %v6260_v46 = vpop.f32.mrb[6].mxu0 }
 0x203   : > { %v5243_v47 = vadd.f32 %v6295_v43, %v7559_v29  ;;  %v6297_v48 = vadd.f32 %v6260_v46, %v6070_v14  ;;  %v4998_v49 = vpop.f32.mrb[7].mxu0 }
 0x204   : > { %v5241_v50 = vadd.f32 %v6296_v45, %v7559_v29  ;;  %v6298_v51 = vadd.f32 %v4998_v49, %v2173_v15 }
 0x205   : > { %5279 = vst [vmem:[%s7563_s11 + $0x30] sm:$0xff] %v5243_v47  ;;  %v5244_v52 = vadd.f32 %v6297_v48, %v7559_v29 }
 0x206   : > { %5277 = vst [vmem:[%s7563_s11 + $0x20] sm:$0xff] %v5241_v50  ;;  %v5242_v53 = vadd.f32 %v6298_v51, %v7559_v29 }
 0x207   : > { %5280 = vst [vmem:[%s7563_s11 + $0x38] sm:$0xff] %v5244_v52 }
 0x208   : > { %5278 = vst [vmem:[%s7563_s11 + $0x28] sm:$0xff] %v5242_v53  ;;  %v6263_v54 = vpop.f32.mrb[8].mxu0 }
 0x209   : > { %v6299_v55 = vadd.f32 %v6263_v54, %v6073_v16  ;;  %v5011_v56 = vpop.f32.mrb[9].mxu0 }
 0x20a   : > { %v6300_v58 = vadd.f32 %v5011_v56, %v2186_v22  ;;  %v6264_v59 = vpop.f32.mrb[10].mxu0 }
 0x20b   : > { %v5247_v40 = vadd.f32 %v6299_v55, %v7559_v29  ;;  %v6301_v60 = vadd.f32 %v6264_v59, %v6074_v17  ;;  %v5014_v61 = vpop.f32.mrb[11].mxu0 }
 0x20c   : > { %v5245_v62 = vadd.f32 %v6300_v58, %v7559_v29  ;;  %v6302_v63 = vadd.f32 %v5014_v61, %v2189_v18 }
 0x20d   : > { %5283 = vst [vmem:[%s7563_s11 + $0x50] sm:$0xff] %v5247_v40  ;;  %v5248_v0 = vadd.f32 %v6301_v60, %v7559_v29 }
 0x20e   : > { %5281 = vst [vmem:[%s7563_s11 + $0x40] sm:$0xff] %v5245_v62  ;;  %v5246_v1 = vadd.f32 %v6302_v63, %v7559_v29 }
 0x20f   : > { %5284 = vst [vmem:[%s7563_s11 + $0x58] sm:$0xff] %v5248_v0 }
 0x210   : > { %v6123_v3 = vpop.f32.mrb[20].mxu1  ;;  %5282 = vst [vmem:[%s7563_s11 + $0x48] sm:$0xff] %v5246_v1  ;;  %v6267_v5 = vpop.f32.mrb[12].mxu0 }
 0x211   : > { %v2879_v38 = vpop.f32.mrb[21].mxu1  ;;  %v6303_v6 = vadd.f32 %v6267_v5, %v7537_v19  ;;  %v5027_v8 = vpop.f32.mrb[13].mxu0 }
 0x212   : > { %v6124_v2 = vpop.f32.mrb[22].mxu1  ;;  %v6304_v36 = vadd.f32 %v5027_v8, %v7539_v20  ;;  %v6268_v9 = vpop.f32.mrb[14].mxu0 }
 0x213   : > { %v2882_v4 = vpop.f32.mrb[23].mxu1  ;;  %v5251_v10 = vadd.f32 %v6303_v6, %v7559_v29  ;;  %v6305_v11 = vadd.f32 %v6268_v9, %v7541_v21  ;;  %v5030_v12 = vpop.f32.mrb[15].mxu0 }
 0x214   : > { %v5249_v13 = vadd.f32 %v6304_v36, %v7559_v29  ;;  %v6306_v14 = vadd.f32 %v5030_v12, %v7543_v23 }
 0x215   : > { %5287 = vst [vmem:[%s7563_s11 + $0x70] sm:$0xff] %v5251_v10  ;;  %v5252_v16 = vadd.f32 %v6305_v11, %v7559_v29 }
 0x216   : > { %5285 = vst [vmem:[%s7563_s11 + $0x60] sm:$0xff] %v5249_v13  ;;  %v5250_v17 = vadd.f32 %v6306_v14, %v7559_v29 }
 0x217   : > { %5288 = vst [vmem:[%s7563_s11 + $0x78] sm:$0xff] %v5252_v16 }
 0x218   : > { %v6127_v15 = vpop.f32.mrb[24].mxu1  ;;  %5286 = vst [vmem:[%s7563_s11 + $0x68] sm:$0xff] %v5250_v17  ;;  %v6271_v20 = vpop.f32.mrb[16].mxu0 }
 0x219   : > { %v2895_v22 = vpop.f32.mrb[25].mxu1  ;;  %v6307_v21 = vadd.f32 %v6271_v20, %v7545_v24  ;;  %v5043_v28 = vpop.f32.mrb[17].mxu0 }
 0x21a   : > { %v6128_v18 = vpop.f32.mrb[26].mxu1  ;;  %v6308_v23 = vadd.f32 %v5043_v28, %v7547_v25  ;;  %v6272_v30 = vpop.f32.mrb[18].mxu0 }
 0x21b   : > { %v2898_v19 = vpop.f32.mrb[27].mxu1  ;;  %v5255_v31 = vadd.f32 %v6307_v21, %v7559_v29  ;;  %v6309_v32 = vadd.f32 %v6272_v30, %v7549_v26  ;;  %v5046_v33 = vpop.f32.mrb[19].mxu0 }
 0x21c   : > { %v5253_v34 = vadd.f32 %v6308_v23, %v7559_v29  ;;  %v6310_v35 = vadd.f32 %v5046_v33, %v7551_v27 }
 0x21d   : > { %5291 = vst [vmem:[%s7563_s11 + $0x90] sm:$0xff] %v5255_v31  ;;  %v5256_v39 = vadd.f32 %v6309_v32, %v7559_v29 }
 0x21e   : > { %5289 = vst [vmem:[%s7563_s11 + $0x80] sm:$0xff] %v5253_v34  ;;  %v5254_v7 = vadd.f32 %v6310_v35, %v7559_v29 }
 0x21f   : > { %5292 = vst [vmem:[%s7563_s11 + $0x98] sm:$0xff] %v5256_v39 }
 0x220   : > { %v6131_v37 = vpop.f32.mrb[28].mxu1  ;;  %5290 = vst [vmem:[%s7563_s11 + $0x88] sm:$0xff] %v5254_v7  ;;  %v6275_v26 = vpop.f32.mrb[20].mxu0 }
 0x221   : > { %v2911_v24 = vpop.f32.mrb[29].mxu1  ;;  %v6311_v41 = vadd.f32 %v6275_v26, %v6123_v3  ;;  %v5059_v42 = vpop.f32.mrb[21].mxu0 }
 0x222   : > { %v6132_v25 = vpop.f32.mrb[30].mxu1  ;;  %v6312_v43 = vadd.f32 %v5059_v42, %v2879_v38  ;;  %v6276_v27 = vpop.f32.mrb[22].mxu0 }
 0x223   : > { %v2914_v57 = vpop.f32.mrb[31].mxu1  ;;  %v5259_v44 = vadd.f32 %v6311_v41, %v7559_v29  ;;  %v6313_v45 = vadd.f32 %v6276_v27, %v6124_v2  ;;  %v5062_v46 = vpop.f32.mrb[23].mxu0 }
 0x224   : > { %v5257_v47 = vadd.f32 %v6312_v43, %v7559_v29  ;;  %v6314_v48 = vadd.f32 %v5062_v46, %v2882_v4 }
 0x225   : > { %5295 = vst [vmem:[%s7563_s11 + $0xb0] sm:$0xff] %v5259_v44  ;;  %v5260_v50 = vadd.f32 %v6313_v45, %v7559_v29 }
 0x226   : > { %5293 = vst [vmem:[%s7563_s11 + $0xa0] sm:$0xff] %v5257_v47  ;;  %v5258_v52 = vadd.f32 %v6314_v48, %v7559_v29 }
 0x227   : > { %5296 = vst [vmem:[%s7563_s11 + $0xb8] sm:$0xff] %v5260_v50 }
 0x228   : > { %v6135_v49 = vpop.f32.mrb[32].mxu1  ;;  %5294 = vst [vmem:[%s7563_s11 + $0xa8] sm:$0xff] %v5258_v52  ;;  %v6279_v55 = vpop.f32.mrb[24].mxu0 }
 0x229   : > { %v2927_v51 = vpop.f32.mrb[33].mxu1  ;;  %v6315_v56 = vadd.f32 %v6279_v55, %v6127_v15  ;;  %v5075_v58 = vpop.f32.mrb[25].mxu0 }
 0x22a   : > { %v6136_v53 = vpop.f32.mrb[34].mxu1  ;;  %v6316_v59 = vadd.f32 %v5075_v58, %v2895_v22  ;;  %v6280_v40 = vpop.f32.mrb[26].mxu0 }
 0x22b   : > { %v2930_v54 = vpop.f32.mrb[35].mxu1  ;;  %v5263_v60 = vadd.f32 %v6315_v56, %v7559_v29  ;;  %v6317_v61 = vadd.f32 %v6280_v40, %v6128_v18  ;;  %v5078_v62 = vpop.f32.mrb[27].mxu0 }
 0x22c   : > { %v5261_v63 = vadd.f32 %v6316_v59, %v7559_v29  ;;  %v6318_v3 = vadd.f32 %v5078_v62, %v2898_v19 }
 0x22d   : > { %5299 = vst [vmem:[%s7563_s11 + $0xd0] sm:$0xff] %v5263_v60  ;;  %v5264_v0 = vadd.f32 %v6317_v61, %v7559_v29 }
 0x22e   : > { %5297 = vst [vmem:[%s7563_s11 + $0xc0] sm:$0xff] %v5261_v63  ;;  %v5262_v38 = vadd.f32 %v6318_v3, %v7559_v29 }
 0x22f   : > { %5300 = vst [vmem:[%s7563_s11 + $0xd8] sm:$0xff] %v5264_v0 }
 0x230   : > { %5298 = vst [vmem:[%s7563_s11 + $0xc8] sm:$0xff] %v5262_v38  ;;  %v6283_v1 = vpop.f32.mrb[28].mxu0 }
 0x231   : > { %v6319_v2 = vadd.f32 %v6283_v1, %v6131_v37  ;;  %v5091_v4 = vpop.f32.mrb[29].mxu0 }
 0x232   : > { %v6320_v5 = vadd.f32 %v5091_v4, %v2911_v24  ;;  %v6284_v6 = vpop.f32.mrb[30].mxu0 }
 0x233   : > { %v5267_v8 = vadd.f32 %v6319_v2, %v7559_v29  ;;  %v6321_v36 = vadd.f32 %v6284_v6, %v6132_v25  ;;  %v5094_v9 = vpop.f32.mrb[31].mxu0 }
 0x234   : > { %v5265_v10 = vadd.f32 %v6320_v5, %v7559_v29  ;;  %v6322_v11 = vadd.f32 %v5094_v9, %v2914_v57 }
 0x235   : > { %5303 = vst [vmem:[%s7563_s11 + $0xf0] sm:$0xff] %v5267_v8  ;;  %v5268_v12 = vadd.f32 %v6321_v36, %v7559_v29 }
 0x236   : > { %5301 = vst [vmem:[%s7563_s11 + $0xe0] sm:$0xff] %v5265_v10  ;;  %v5266_v13 = vadd.f32 %v6322_v11, %v7559_v29 }
 0x237   : > { %5304 = vst [vmem:[%s7563_s11 + $0xf8] sm:$0xff] %v5268_v12 }
 0x238   : > { %5302 = vst [vmem:[%s7563_s11 + $0xe8] sm:$0xff] %v5266_v13  ;;  %v6287_v14 = vpop.f32.mrb[32].mxu0 }
 0x239   : > { %v6323_v15 = vadd.f32 %v6287_v14, %v6135_v49  ;;  %v5107_v16 = vpop.f32.mrb[33].mxu0 }
 0x23a   : > { %v6324_v22 = vadd.f32 %v5107_v16, %v2927_v51  ;;  %v6288_v17 = vpop.f32.mrb[34].mxu0 }
 0x23b   : > { %v5271_v18 = vadd.f32 %v6323_v15, %v7559_v29  ;;  %v6325_v19 = vadd.f32 %v6288_v17, %v6136_v53  ;;  %v5110_v20 = vpop.f32.mrb[35].mxu0 }
 0x23c   : > { %v5269_v21 = vadd.f32 %v6324_v22, %v7559_v29  ;;  %v6326_v28 = vadd.f32 %v5110_v20, %v2930_v54 }
 0x23d   : > { %5307 = vst [vmem:[%s7563_s11 + $0x110] sm:$0xff] %v5271_v18  ;;  %v5272_v23 = vadd.f32 %v6325_v19, %v7559_v29 }
 0x23e   : > { %5305 = vst [vmem:[%s7563_s11 + $0x100] sm:$0xff] %v5269_v21  ;;  %v5270_v30 = vadd.f32 %v6326_v28, %v7559_v29 }
 0x23f   : > { %5308 = vst [vmem:[%s7563_s11 + $0x118] sm:$0xff] %v5272_v23 }
 0x240   : > { %5306 = vst [vmem:[%s7563_s11 + $0x108] sm:$0xff] %v5270_v30 }
 0x241   : > { %6832 = shalt.err (!%p6829_p5)
}
 0x242   : > { %s6833_s4 = scalar_lea.hbm %s7644_s15, 4608  ;;  %s6837_s7 = scalar_lea.hbm %s7703_s3, 9216 }
 0x243   : > { %p6834_p6 = scmp.ne.s32.totalorder %s7644_s15, %s6833_s4  ;;  %p6838_p10 = scmp.lt.u32.totalorder %s7644_s15, %s7703_s3 }
 0x244   : > { %p6839_p11 = scmp.lt.u32.totalorder %s6837_s7, %s6833_s4  ;;  %p6841_p13 = scmp.lt.u32.totalorder %s6833_s4, %s7644_s15 }
 0x245   : > { %p6835_p7 = pnand %p6834_p6, %p6962_p4 }
 0x246   : > { %p6840_p12 = por %p6839_p11, %p6838_p10 }
 0x247   : > { %p6836_p9 = pneg %p6835_p7 }
 0x248   : > { %p6842_p0 = por %p6841_p13, %p6840_p12 }
 0x24a   : > { %p6843_p1 = pnand %p6842_p0, %p6836_p9 }
 0x24c   : > { %6846 = shalt.err (!%p6843_p1)
}
 0x24d   : > { %s6900_s10 = smov 128   ;;  %s6901_s11 = smov 8  }
 0x24e   : > { %6591 = dma.vmem_to_hbm [thread:$0]  (%p6962_p4), %s7646_s19, 4608, %s7644_s15, %s7654_s26, %s6900_s10, %s6900_s10, %s6901_s11  }
 0x24f PF: > { %p6597_p2 = scmp.ge.s32.totalorder %s6897_s17, 2  ;;  %s5339_s18 = sand.u32 1, %s6877_s12  }
 0x250   : > { %s5340_s21 = scalar_lea.sflag [#allocation4], %s5339_s18 }
 0x251   : > { %p6594_p3 = pnand %p6597_p2, %p6969_p8 }
 0x253   : > { %6872 = dma.done.wait (!%p6594_p3), %s5340_s21, 4608  }
 0x254   : > { %6874 = vsyncadd (!%p6594_p3), %s5340_s21, 4294962688  ;;  %s16_s17 = sadd.s32 1, %s6897_s17   ;;  %s7706_s12 = smov %s6881_s13 }
 0x255   : > { %p13_p5 = scmp.ge.s32.totalorder %s16_s17, 4   ;;  %s7707_s13 = smov %s6885_s14 }
 0x256   : > { %s7708_s14 = smov %s6975_s25  ;;  %s7709_s15 = smov %s6893_s16 }
 0x257   : > { %s7710_s16 = smov %s7712_s20  ;;  %15 = sbr.rel (!%p13_p5) target bundleno = 4 (0x4), region = 81 }
 0x25e   :  { %5345 = vsyncpa [#allocation4], 1 }
 0x25f   :  { %5347 = vsyncpa [#allocation4 + $0x1], 1 }

</bundles_post_ra>
